<compile_context>
chip_gen: v7x
topology: tpu7x:2x2x1
jax: 0.10.0
libtpu: 0.0.40
codegen_flags: <defaults>
</compile_context>

<pallas_src>
import functools
import math

import jax
import jax.numpy as jnp
from jax.experimental import pallas as pl
from jax.experimental.pallas import tpu as pltpu


def _layer_norm(x, gamma, beta, eps):
    # x: (..., D); gamma/beta: (1, D). Biased variance over last dim (matches nn.LayerNorm).
    mean = jnp.mean(x, axis=-1, keepdims=True)
    var = jnp.mean((x - mean) ** 2, axis=-1, keepdims=True)
    return (x - mean) * jax.lax.rsqrt(var + eps) * gamma + beta


def cross_bert_kernel(q_ref, kv_ref, bias_ref,
                      wq_ref, wk_ref, wv_ref, wo_ref,
                      ln1g_ref, ln1b_ref,
                      w1_ref, b1_ref, w2_ref, b2_ref,
                      ln2g_ref, ln2b_ref,
                      *out_refs, n_head, d_k, d_v, with_attn,
                      resident_weights, ln_eps):
    """One (batch, q-tile) block of one CrossTransformerBlock.

    Grid = (B, Lq_tiles, n_layers); the layer axis is innermost and the `out` block index does
    not depend on it, so `out_ref` is the resident q-stream carry across layers.
    """
    if with_attn:
        out_ref, attn_ref = out_refs
    else:
        (out_ref,) = out_refs
        attn_ref = None

    layer = pl.program_id(2)
    # Resident weights: whole (n_layers, ...) stack lives in VMEM, index it by `layer`.
    # Streaming weights: the block is the current layer's slice, index 0.
    widx = layer if resident_weights else 0

    # Layer 0: seed the resident output block with the q-stream input (f32 residual stream).
    @pl.when(layer == 0)
    def _():
        out_ref[0] = q_ref[0]

    x_in = out_ref[0]                   # (tq, D)  f32 residual stream (previous layer output)
    kv = kv_ref[0]                      # (Lk, D)  bf16

    H, dk, dv = n_head, d_k, d_v
    bf16 = jnp.bfloat16
    x_bf = x_in.astype(bf16)

    # --- multi-head cross attention (no-bias projections) -----------------------------
    # 1/sqrt(d_k) is already folded into wq on the host. Cast to bf16 *before* the head
    # split so all head-split temporaries are half-width.
    Q = jnp.dot(x_bf, wq_ref[widx], preferred_element_type=jnp.float32).astype(bf16)  # (tq, H*dk)
    K = jnp.dot(kv, wk_ref[widx], preferred_element_type=jnp.float32).astype(bf16)    # (Lk, H*dk)
    V = jnp.dot(kv, wv_ref[widx], preferred_element_type=jnp.float32).astype(bf16)    # (Lk, H*dv)

    # Head-batched views (leading head axis; static lane slices, stacked on a leading dim).
    Qh = jnp.stack([Q[:, h * dk:(h + 1) * dk] for h in range(H)], axis=0)  # (H, tq, dk) bf16
    Kh = jnp.stack([K[:, h * dk:(h + 1) * dk] for h in range(H)], axis=0)  # (H, Lk, dk) bf16
    Vh = jnp.stack([V[:, h * dv:(h + 1) * dv] for h in range(H)], axis=0)  # (H, Lk, dv) bf16

    # Batched scores over all heads at once.
    scores = jnp.einsum('hqd,hkd->hqk', Qh, Kh,
                        preferred_element_type=jnp.float32)                # (H, tq, Lk) f32
    scores = scores + bias_ref[0].astype(jnp.float32)[None, :, :]          # additive mask bias
    scores = scores - jnp.max(scores, axis=-1, keepdims=True)              # stable softmax
    e = jnp.exp(scores)
    denom = jnp.sum(e, axis=-1, keepdims=True)                             # (H, tq, 1)
    attn = e * (1.0 / denom)                                               # exact reciprocal
    if attn_ref is not None:
        attn_ref[0, 0] = attn.astype(attn_ref.dtype)                       # bf16 writeback

    # Batched context and per-head output projection (sum over heads; no lane-axis concat).
    ctx = jnp.einsum('hqk,hkd->hqd', attn.astype(bf16), Vh,
                     preferred_element_type=jnp.float32)                   # (H, tq, dv)
    o_heads = jnp.einsum('hqv,hvd->hqd', ctx.astype(bf16), wo_ref[widx],
                         preferred_element_type=jnp.float32)               # (H, tq, D)
    attn_out = jnp.sum(o_heads, axis=0)                                    # (tq, D)

    y = _layer_norm(attn_out + x_in, ln1g_ref[widx], ln1b_ref[widx], ln_eps)

    # --- position-wise feed forward ----------------------------------------------------
    h1 = jnp.maximum(
        jnp.dot(y.astype(bf16), w1_ref[widx], preferred_element_type=jnp.float32)
        + b1_ref[widx], 0.0)                                               # (tq, d_inner)
    f = (jnp.dot(h1.astype(bf16), w2_ref[widx], preferred_element_type=jnp.float32)
         + b2_ref[widx] + y)
    out_ref[0] = _layer_norm(f, ln2g_ref[widx], ln2b_ref[widx], ln_eps)


def _stack(layers, name, dtype=jnp.float32):
    return jnp.stack([p[name] for p in layers]).astype(dtype)


def _vmem_budget():
    """(physical VMEM capacity, per-call scoped VMEM limit) in bytes, with a safe fallback."""
    cap = 64 * 1024 * 1024
    try:
        cap = int(pltpu.get_tpu_info().vmem_capacity_bytes)
    except Exception:
        pass
    limit = int(min(cap * 3 // 4, 100 * 1024 * 1024))
    return cap, limit


def _pick_q_tile(Lq, target):
    """Largest q tile <= target that divides Lq and keeps the sublane dim (8,·)-friendly."""
    best = Lq
    for t in range(1, Lq + 1):
        if Lq % t == 0 and t <= target and (t == Lq or t % 8 == 0):
            best = t
    return best


def cross_bert_forward(input_1, input_2, mask, layers, *, n_head, d_k, d_v,
                       return_attn=True, block_q=None, resident_weights=None,
                       attn_dtype=jnp.bfloat16, ln_eps=1e-6):
    """Mirrors CrossBERT.forward: q stream updates through layers, kv stream fixed."""
    if mask is None:
        return None  # reference module returns nothing when mask is None

    B, Lq, D = input_1.shape
    Lk = input_2.shape[1]
    H = n_head
    n_layers = len(layers)
    bf16 = jnp.bfloat16

    # Per-generation VMEM budget and q tiling (keeps quadratic blocks inside VMEM while
    # preferring n_q == 1 so K/V projections and mask DMA are not replayed per q tile).
    vmem_cap, vmem_limit = _vmem_budget()
    if block_q is None:
        block_q = 128 if vmem_cap <= 64 * 1024 * 1024 else 512
    tq = _pick_q_tile(Lq, block_q)
    n_q = Lq // tq

    # Stacked per-layer weights; matmul operands in bf16, epilogue params in f32.
    wq = (_stack(layers, "wq") * (1.0 / math.sqrt(d_k))).astype(bf16)   # (L, D, H*dk), scale folded
    wk = _stack(layers, "wk", bf16)                                     # (L, D, H*dk)
    wv = _stack(layers, "wv", bf16)                                     # (L, D, H*dv)
    wo = _stack(layers, "wo").reshape(n_layers, H, d_v, D).astype(bf16) # (L, H, dv, D)
    w1 = _stack(layers, "w1", bf16)                                     # (L, D, d_inner)
    w2 = _stack(layers, "w2", bf16)                                     # (L, d_inner, D)
    ln1g = _stack(layers, "ln1g"); ln1b = _stack(layers, "ln1b")
    ln2g = _stack(layers, "ln2g"); ln2b = _stack(layers, "ln2b")
    b1 = _stack(layers, "b1");     b2 = _stack(layers, "b2")
    weights = (wq, wk, wv, wo, ln1g, ln1b, w1, b1, w2, b2, ln2g, ln2b)

    weight_bytes = sum(int(w.size) * w.dtype.itemsize for w in weights)
    if resident_weights is None:
        # Keep the whole stacked weight set resident in VMEM only if it comfortably fits
        # (leave room for double buffering, activations and softmax temporaries).
        resident_weights = weight_bytes <= vmem_limit // 3

    # Additive attention bias (0 where attend, -1e9 where masked), bf16 to halve DMA.
    bias = jnp.where(mask == 0, -1e9, 0.0).astype(bf16)                 # (B, Lq, Lk)
    kv = input_2.astype(bf16)
    q = input_1.astype(jnp.float32)

    def w_spec(arr):
        nd = arr.ndim
        if resident_weights:
            # Grid-invariant block: fetched once per core, indexed by `layer` in-kernel.
            return pl.BlockSpec(arr.shape, lambda b, qi, l, _n=nd: (0,) * _n)
        # Streaming: one layer slice per grid step along the innermost (layer) axis.
        return pl.BlockSpec((1,) + arr.shape[1:],
                            lambda b, qi, l, _n=nd: (l,) + (0,) * (_n - 1))

    in_specs = [
        pl.BlockSpec((1, tq, D), lambda b, qi, l: (b, qi, 0)),    # q stream (f32)
        pl.BlockSpec((1, Lk, D), lambda b, qi, l: (b, 0, 0)),     # kv (bf16)
        pl.BlockSpec((1, tq, Lk), lambda b, qi, l: (b, qi, 0)),   # additive mask bias (bf16)
    ] + [w_spec(w) for w in weights]

    # Output block index ignores the layer axis -> resident VMEM carry across layers.
    out_specs = [pl.BlockSpec((1, tq, D), lambda b, qi, l: (b, qi, 0))]
    out_shape = [jax.ShapeDtypeStruct((B, Lq, D), jnp.float32)]
    if return_attn:
        out_specs.append(
            pl.BlockSpec((1, 1, H, tq, Lk), lambda b, qi, l: (b, l, 0, qi, 0)))
        out_shape.append(
            jax.ShapeDtypeStruct((B, n_layers, H, Lq, Lk), attn_dtype))

    # Advisory cost estimate so XLA schedules surrounding ops around the long custom call.
    d_inner_dim = int(w1.shape[-1])
    flops = 2 * B * n_layers * (
        Lq * D * H * d_k
        + n_q * Lk * D * H * (d_k + d_v)
        + H * Lq * Lk * (d_k + d_v)
        + Lq * H * d_v * D
        + 2 * Lq * D * d_inner_dim)
    bytes_accessed = (int(q.size) * 4 + int(kv.size) * 2 + int(bias.size) * 2
                      + weight_bytes * (1 if resident_weights else B * n_q)
                      + B * Lq * D * 4)
    if return_attn:
        bytes_accessed += B * n_layers * H * Lq * Lk * jnp.dtype(attn_dtype).itemsize
    cost = pl.CostEstimate(flops=int(flops),
                           transcendentals=int(B * n_layers * H * Lq * Lk),
                           bytes_accessed=int(bytes_accessed))

    kernel = functools.partial(cross_bert_kernel, n_head=H, d_k=d_k, d_v=d_v,
                               with_attn=return_attn,
                               resident_weights=resident_weights, ln_eps=ln_eps)

    results = pl.pallas_call(
        kernel,
        out_shape=tuple(out_shape),
        grid_spec=pltpu.PrefetchScalarGridSpec(
            num_scalar_prefetch=0,
            grid=(B, n_q, n_layers),
            in_specs=in_specs,
            out_specs=tuple(out_specs),
        ),
        compiler_params=pltpu.CompilerParams(
            dimension_semantics=("parallel", "parallel", "arbitrary"),
            vmem_limit_bytes=vmem_limit),
        cost_estimate=cost,
    )(q, kv, bias, *weights)

    if return_attn:
        out, attn_all = results
        return out, [attn_all[:, l] for l in range(n_layers)]
    (out,) = results
    return out


def _reference_forward(input_1, input_2, mask, layers, *, n_head, d_k, d_v, eps):
    """Pure-JAX f32 reference of the same forward (for correctness checking)."""
    B, Lq, D = input_1.shape
    Lk = input_2.shape[1]
    bias = jnp.where(mask == 0, -1e9, 0.0)[:, None]          # (B, 1, Lq, Lk)
    x = input_1
    attns = []
    for p in layers:
        qh = (x @ p["wq"]).reshape(B, Lq, n_head, d_k).transpose(0, 2, 1, 3)
        kh = (input_2 @ p["wk"]).reshape(B, Lk, n_head, d_k).transpose(0, 2, 1, 3)
        vh = (input_2 @ p["wv"]).reshape(B, Lk, n_head, d_v).transpose(0, 2, 1, 3)
        s = jnp.einsum('bhqd,bhkd->bhqk', qh, kh) / math.sqrt(d_k) + bias
        a = jax.nn.softmax(s, axis=-1)
        attns.append(a)
        ctx = jnp.einsum('bhqk,bhkd->bhqd', a, vh).transpose(0, 2, 1, 3)
        ctx = ctx.reshape(B, Lq, n_head * d_v)
        o = ctx @ p["wo"]
        y = _layer_norm(o + x, p["ln1g"], p["ln1b"], eps)
        h = jax.nn.relu(y @ p["w1"] + p["b1"])
        f = h @ p["w2"] + p["b2"] + y
        x = _layer_norm(f, p["ln2g"], p["ln2b"], eps)
    return x, attns


def init_params(key, n_layers, d_model, d_k, d_v, n_head, d_inner):
    """Deterministic synthetic parameters (shapes implied by the module __init__)."""
    layers = []
    for l in range(n_layers):
        ks = jax.random.split(jax.random.fold_in(key, l), 6)
        lin = lambda k, shape: (jax.random.normal(k, shape, jnp.float32) * 0.02)
        layers.append(dict(
            wq=lin(ks[0], (d_model, n_head * d_k)),
            wk=lin(ks[1], (d_model, n_head * d_k)),
            wv=lin(ks[2], (d_model, n_head * d_v)),
            wo=lin(ks[3], (n_head * d_v, d_model)),
            ln1g=jnp.ones((1, d_model), jnp.float32),
            ln1b=jnp.zeros((1, d_model), jnp.float32),
            w1=lin(ks[4], (d_model, d_inner)),
            b1=jnp.zeros((1, d_inner), jnp.float32),
            w2=lin(ks[5], (d_inner, d_model)),
            b2=jnp.zeros((1, d_model), jnp.float32),
            ln2g=jnp.ones((1, d_model), jnp.float32),
            ln2b=jnp.zeros((1, d_model), jnp.float32),
        ))
    return layers


if __name__ == "__main__":
    # Small shapes consistent with the module's forward.
    B, Lq, Lk = 2, 8, 8
    d_model, n_layers, d_k, d_v, n_head, d_inner = 32, 2, 8, 8, 4, 64

    key = jax.random.PRNGKey(0)
    k1, k2, k3, kp = jax.random.split(key, 4)

    input_1 = jax.random.normal(k1, (B, Lq, d_model), jnp.float32)
    input_2 = jax.random.normal(k2, (B, Lk, d_model), jnp.float32)
    # mask: 1 = attend, 0 = masked (becomes a -1e9 additive bias before softmax)
    mask = (jax.random.uniform(k3, (B, Lq, Lk)) > 0.2).astype(jnp.float32)
    mask = mask.at[:, :, 0].set(1.0)  # keep at least one valid key per query row

    layers = init_params(kp, n_layers, d_model, d_k, d_v, n_head, d_inner)

    cross_output, attn_list = cross_bert_forward(
        input_1, input_2, mask, layers, n_head=n_head, d_k=d_k, d_v=d_v,
        return_attn=True)
    jax.block_until_ready(cross_output)
    for a in attn_list:
        jax.block_until_ready(a)

    assert cross_output.shape == (B, Lq, d_model)
    assert len(attn_list) == n_layers
    assert attn_list[0].shape == (B, n_head, Lq, Lk)
    assert bool(jnp.all(jnp.isfinite(cross_output)))
    # attention rows should sum to ~1 (stored in bf16)
    row_sums = attn_list[0].astype(jnp.float32).sum(axis=-1)
    assert bool(jnp.allclose(row_sums, 1.0, atol=3e-2))

    # compare against a pure-JAX f32 reference (loose tolerance for bf16 matmul operands)
    ref_out, ref_attn = _reference_forward(
        input_1, input_2, mask, layers, n_head=n_head, d_k=d_k, d_v=d_v, eps=1e-6)
    assert bool(jnp.allclose(cross_output, ref_out, atol=5e-2, rtol=5e-2))
    assert bool(jnp.allclose(attn_list[0].astype(jnp.float32), ref_attn[0], atol=2e-2))

    # return_attn=False path (no attention-probability output allocated at all)
    out_only = cross_bert_forward(
        input_1, input_2, mask, layers, n_head=n_head, d_k=d_k, d_v=d_v,
        return_attn=False)
    jax.block_until_ready(out_only)
    assert out_only.shape == (B, Lq, d_model)
    assert bool(jnp.allclose(out_only, cross_output, atol=1e-5))

    # per-layer weight-streaming path (used automatically when the stacked weights
    # would not fit the VMEM budget)
    out_stream = cross_bert_forward(
        input_1, input_2, mask, layers, n_head=n_head, d_k=d_k, d_v=d_v,
        return_attn=False, resident_weights=False)
    jax.block_until_ready(out_stream)
    assert bool(jnp.allclose(out_stream, cross_output, atol=1e-5))

    print("KERNEL_OK")
</pallas_src>

<mosaic_0001>
module attributes {stable_mosaic.version = 11 : i64} {
  func.func @cross_bert_kernel(%arg0: i32, %arg1: i32, %arg2: i32, %arg3: memref<1x8x32xf32, #tpu.memory_space<vmem>>, %arg4: memref<1x8x32xbf16, #tpu.memory_space<vmem>>, %arg5: memref<1x8x8xbf16, #tpu.memory_space<vmem>>, %arg6: memref<2x32x32xbf16, #tpu.memory_space<vmem>>, %arg7: memref<2x32x32xbf16, #tpu.memory_space<vmem>>, %arg8: memref<2x32x32xbf16, #tpu.memory_space<vmem>>, %arg9: memref<2x4x8x32xbf16, #tpu.memory_space<vmem>>, %arg10: memref<2x1x32xf32, #tpu.memory_space<vmem>>, %arg11: memref<2x1x32xf32, #tpu.memory_space<vmem>>, %arg12: memref<2x32x64xbf16, #tpu.memory_space<vmem>>, %arg13: memref<2x1x64xf32, #tpu.memory_space<vmem>>, %arg14: memref<2x64x32xbf16, #tpu.memory_space<vmem>>, %arg15: memref<2x1x32xf32, #tpu.memory_space<vmem>>, %arg16: memref<2x1x32xf32, #tpu.memory_space<vmem>>, %arg17: memref<2x1x32xf32, #tpu.memory_space<vmem>>, %arg18: memref<1x8x32xf32, #tpu.memory_space<vmem>>, %arg19: memref<1x1x4x8x8xbf16, #tpu.memory_space<vmem>>) attributes {dimension_semantics = [#tpu.dimension_semantics<parallel>, #tpu.dimension_semantics<parallel>, #tpu.dimension_semantics<arbitrary>], iteration_bounds = array<i64: 2, 1, 2>, scalar_prefetch = 0 : i64, scratch_operands = 0 : i64, tpu.core_type = #tpu.core_type<tc>, window_params = [{transform_indices = @transform_0, window_bounds = array<i64: 1, 8, 32>}, {transform_indices = @transform_1, window_bounds = array<i64: 1, 8, 32>}, {transform_indices = @transform_2, window_bounds = array<i64: 1, 8, 8>}, {pipeline_mode = #tpu.pipeline_mode<synchronous>, transform_indices = @transform_3, window_bounds = array<i64: 2, 32, 32>}, {pipeline_mode = #tpu.pipeline_mode<synchronous>, transform_indices = @transform_4, window_bounds = array<i64: 2, 32, 32>}, {pipeline_mode = #tpu.pipeline_mode<synchronous>, transform_indices = @transform_5, window_bounds = array<i64: 2, 32, 32>}, {pipeline_mode = #tpu.pipeline_mode<synchronous>, transform_indices = @transform_6, window_bounds = array<i64: 2, 4, 8, 32>}, {pipeline_mode = #tpu.pipeline_mode<synchronous>, transform_indices = @transform_7, window_bounds = array<i64: 2, 1, 32>}, {pipeline_mode = #tpu.pipeline_mode<synchronous>, transform_indices = @transform_8, window_bounds = array<i64: 2, 1, 32>}, {pipeline_mode = #tpu.pipeline_mode<synchronous>, transform_indices = @transform_9, window_bounds = array<i64: 2, 32, 64>}, {pipeline_mode = #tpu.pipeline_mode<synchronous>, transform_indices = @transform_10, window_bounds = array<i64: 2, 1, 64>}, {pipeline_mode = #tpu.pipeline_mode<synchronous>, transform_indices = @transform_11, window_bounds = array<i64: 2, 64, 32>}, {pipeline_mode = #tpu.pipeline_mode<synchronous>, transform_indices = @transform_12, window_bounds = array<i64: 2, 1, 32>}, {pipeline_mode = #tpu.pipeline_mode<synchronous>, transform_indices = @transform_13, window_bounds = array<i64: 2, 1, 32>}, {pipeline_mode = #tpu.pipeline_mode<synchronous>, transform_indices = @transform_14, window_bounds = array<i64: 2, 1, 32>}, {transform_indices = @transform_15, window_bounds = array<i64: 1, 8, 32>}, {transform_indices = @transform_16, window_bounds = array<i64: 1, 1, 4, 8, 8>}]} {
    %c0_i32 = arith.constant 0 : i32
    %0 = arith.cmpi eq, %arg2, %c0_i32 : i32
    %1 = arith.extui %0 : i1 to i32
    %c0_i32_0 = arith.constant 0 : i32
    %2 = arith.cmpi ne, %1, %c0_i32_0 : i32
    scf.if %2 {
      %c0_64 = arith.constant 0 : index
      %c0_65 = arith.constant 0 : index
      %c0_66 = arith.constant 0 : index
      %163 = vector.load %arg3[%c0_64, %c0_65, %c0_66] : memref<1x8x32xf32, #tpu.memory_space<vmem>>, vector<1x8x32xf32>
      %164 = vector.shape_cast %163 : vector<1x8x32xf32> to vector<8x32xf32>
      %c0_67 = arith.constant 0 : index
      %c0_68 = arith.constant 0 : index
      %c0_69 = arith.constant 0 : index
      %165 = vector.load %arg18[%c0_67, %c0_68, %c0_69] : memref<1x8x32xf32, #tpu.memory_space<vmem>>, vector<1x8x32xf32>
      %166 = vector.shape_cast %165 : vector<1x8x32xf32> to vector<8x32xf32>
      %167 = vector.shape_cast %164 : vector<8x32xf32> to vector<1x8x32xf32>
      tpu.vector_store %arg18[%c0_67, %c0_68, %c0_69], %167 {strides = array<i32>} : memref<1x8x32xf32, #tpu.memory_space<vmem>>, vector<1x8x32xf32>,
    } else {
    }
    %c0 = arith.constant 0 : index
    %c0_1 = arith.constant 0 : index
    %c0_2 = arith.constant 0 : index
    %3 = vector.load %arg18[%c0, %c0_1, %c0_2] : memref<1x8x32xf32, #tpu.memory_space<vmem>>, vector<1x8x32xf32>
    %4 = vector.shape_cast %3 : vector<1x8x32xf32> to vector<8x32xf32>
    %c0_3 = arith.constant 0 : index
    %c0_4 = arith.constant 0 : index
    %c0_5 = arith.constant 0 : index
    %5 = vector.load %arg4[%c0_3, %c0_4, %c0_5] : memref<1x8x32xbf16, #tpu.memory_space<vmem>>, vector<1x8x32xbf16>
    %6 = vector.shape_cast %5 : vector<1x8x32xbf16> to vector<8x32xbf16>
    %7 = arith.truncf %4 : vector<8x32xf32> to vector<8x32xbf16>
    %8 = arith.index_cast %arg2 : i32 to index
    %c0_6 = arith.constant 0 : index
    %c0_7 = arith.constant 0 : index
    %9 = vector.load %arg6[%8, %c0_6, %c0_7] : memref<2x32x32xbf16, #tpu.memory_space<vmem>>, vector<1x32x32xbf16>
    %10 = vector.shape_cast %9 : vector<1x32x32xbf16> to vector<32x32xbf16>
    %cst = arith.constant dense<0.000000e+00> : vector<8x32xf32>
    %11 = tpu.matmul %7, %10, %cst {dimension_numbers = #tpu.dot_dimension_numbers<[1], [0], [0], [1], [0, 0, 1, 1], [], []>} : vector<8x32xbf16>, vector<32x32xbf16>, vector<8x32xf32> -> vector<8x32xf32>
    %12 = arith.truncf %11 : vector<8x32xf32> to vector<8x32xbf16>
    %13 = arith.index_cast %arg2 : i32 to index
    %c0_8 = arith.constant 0 : index
    %c0_9 = arith.constant 0 : index
    %14 = vector.load %arg7[%13, %c0_8, %c0_9] : memref<2x32x32xbf16, #tpu.memory_space<vmem>>, vector<1x32x32xbf16>
    %15 = vector.shape_cast %14 : vector<1x32x32xbf16> to vector<32x32xbf16>
    %cst_10 = arith.constant dense<0.000000e+00> : vector<8x32xf32>
    %16 = tpu.matmul %6, %15, %cst_10 {dimension_numbers = #tpu.dot_dimension_numbers<[1], [0], [0], [1], [0, 0, 1, 1], [], []>} : vector<8x32xbf16>, vector<32x32xbf16>, vector<8x32xf32> -> vector<8x32xf32>
    %17 = arith.truncf %16 : vector<8x32xf32> to vector<8x32xbf16>
    %18 = arith.index_cast %arg2 : i32 to index
    %c0_11 = arith.constant 0 : index
    %c0_12 = arith.constant 0 : index
    %19 = vector.load %arg8[%18, %c0_11, %c0_12] : memref<2x32x32xbf16, #tpu.memory_space<vmem>>, vector<1x32x32xbf16>
    %20 = vector.shape_cast %19 : vector<1x32x32xbf16> to vector<32x32xbf16>
    %cst_13 = arith.constant dense<0.000000e+00> : vector<8x32xf32>
    %21 = tpu.matmul %6, %20, %cst_13 {dimension_numbers = #tpu.dot_dimension_numbers<[1], [0], [0], [1], [0, 0, 1, 1], [], []>} : vector<8x32xbf16>, vector<32x32xbf16>, vector<8x32xf32> -> vector<8x32xf32>
    %22 = arith.truncf %21 : vector<8x32xf32> to vector<8x32xbf16>
    %23 = vector.extract_strided_slice %12 {offsets = [0, 0], sizes = [8, 8], strides = [1, 1]} : vector<8x32xbf16> to vector<8x8xbf16>
    %24 = vector.extract_strided_slice %12 {offsets = [0, 8], sizes = [8, 8], strides = [1, 1]} : vector<8x32xbf16> to vector<8x8xbf16>
    %25 = vector.extract_strided_slice %12 {offsets = [0, 16], sizes = [8, 8], strides = [1, 1]} : vector<8x32xbf16> to vector<8x8xbf16>
    %26 = vector.extract_strided_slice %12 {offsets = [0, 24], sizes = [8, 8], strides = [1, 1]} : vector<8x32xbf16> to vector<8x8xbf16>
    %27 = vector.shape_cast %23 : vector<8x8xbf16> to vector<1x8x8xbf16>
    %28 = vector.shape_cast %24 : vector<8x8xbf16> to vector<1x8x8xbf16>
    %29 = vector.shape_cast %25 : vector<8x8xbf16> to vector<1x8x8xbf16>
    %30 = vector.shape_cast %26 : vector<8x8xbf16> to vector<1x8x8xbf16>
    %31 = tpu.concatenate %27, %28, %29, %30 in 0 : vector<1x8x8xbf16>, vector<1x8x8xbf16>, vector<1x8x8xbf16>, vector<1x8x8xbf16> -> vector<4x8x8xbf16>
    %32 = vector.extract_strided_slice %17 {offsets = [0, 0], sizes = [8, 8], strides = [1, 1]} : vector<8x32xbf16> to vector<8x8xbf16>
    %33 = vector.extract_strided_slice %17 {offsets = [0, 8], sizes = [8, 8], strides = [1, 1]} : vector<8x32xbf16> to vector<8x8xbf16>
    %34 = vector.extract_strided_slice %17 {offsets = [0, 16], sizes = [8, 8], strides = [1, 1]} : vector<8x32xbf16> to vector<8x8xbf16>
    %35 = vector.extract_strided_slice %17 {offsets = [0, 24], sizes = [8, 8], strides = [1, 1]} : vector<8x32xbf16> to vector<8x8xbf16>
    %36 = vector.shape_cast %32 : vector<8x8xbf16> to vector<1x8x8xbf16>
    %37 = vector.shape_cast %33 : vector<8x8xbf16> to vector<1x8x8xbf16>
    %38 = vector.shape_cast %34 : vector<8x8xbf16> to vector<1x8x8xbf16>
    %39 = vector.shape_cast %35 : vector<8x8xbf16> to vector<1x8x8xbf16>
    %40 = tpu.concatenate %36, %37, %38, %39 in 0 : vector<1x8x8xbf16>, vector<1x8x8xbf16>, vector<1x8x8xbf16>, vector<1x8x8xbf16> -> vector<4x8x8xbf16>
    %41 = vector.extract_strided_slice %22 {offsets = [0, 0], sizes = [8, 8], strides = [1, 1]} : vector<8x32xbf16> to vector<8x8xbf16>
    %42 = vector.extract_strided_slice %22 {offsets = [0, 8], sizes = [8, 8], strides = [1, 1]} : vector<8x32xbf16> to vector<8x8xbf16>
    %43 = vector.extract_strided_slice %22 {offsets = [0, 16], sizes = [8, 8], strides = [1, 1]} : vector<8x32xbf16> to vector<8x8xbf16>
    %44 = vector.extract_strided_slice %22 {offsets = [0, 24], sizes = [8, 8], strides = [1, 1]} : vector<8x32xbf16> to vector<8x8xbf16>
    %45 = vector.shape_cast %41 : vector<8x8xbf16> to vector<1x8x8xbf16>
    %46 = vector.shape_cast %42 : vector<8x8xbf16> to vector<1x8x8xbf16>
    %47 = vector.shape_cast %43 : vector<8x8xbf16> to vector<1x8x8xbf16>
    %48 = vector.shape_cast %44 : vector<8x8xbf16> to vector<1x8x8xbf16>
    %49 = tpu.concatenate %45, %46, %47, %48 in 0 : vector<1x8x8xbf16>, vector<1x8x8xbf16>, vector<1x8x8xbf16>, vector<1x8x8xbf16> -> vector<4x8x8xbf16>
    "tpu.trace_start"() <{level = 10 : i32, message = "hqd,hkd->hqk"}> : () -> ()
    %cst_14 = arith.constant dense<0.000000e+00> : vector<4x8x8xf32>
    %50 = tpu.matmul %31, %40, %cst_14 {dimension_numbers = #tpu.dot_dimension_numbers<[2], [2], [1], [1], [0, 0, 0, 1, 1, 1], [0], [0]>} : vector<4x8x8xbf16>, vector<4x8x8xbf16>, vector<4x8x8xf32> -> vector<4x8x8xf32>
    "tpu.trace_stop"() : () -> ()
    %c0_15 = arith.constant 0 : index
    %c0_16 = arith.constant 0 : index
    %c0_17 = arith.constant 0 : index
    %51 = vector.load %arg5[%c0_15, %c0_16, %c0_17] : memref<1x8x8xbf16, #tpu.memory_space<vmem>>, vector<1x8x8xbf16>
    %52 = vector.shape_cast %51 : vector<1x8x8xbf16> to vector<8x8xbf16>
    %53 = arith.extf %52 : vector<8x8xbf16> to vector<8x8xf32>
    %54 = vector.shape_cast %53 : vector<8x8xf32> to vector<1x8x8xf32>
    %55 = vector.broadcast %54 : vector<1x8x8xf32> to vector<4x8x8xf32>
    %56 = arith.addf %50, %55 : vector<4x8x8xf32>
    %cst_18 = arith.constant dense<0xFF800000> : vector<4x8xf32>
    %57 = vector.multi_reduction <maximumf>, %56, %cst_18 [2] : vector<4x8x8xf32> to vector<4x8xf32>
    %58 = vector.shape_cast %57 : vector<4x8xf32> to vector<4x8x1xf32>
    %59 = vector.broadcast %58 : vector<4x8x1xf32> to vector<4x8x8xf32>
    %60 = arith.subf %56, %59 : vector<4x8x8xf32>
    %61 = math.exp %60 : vector<4x8x8xf32>
    %cst_19 = arith.constant dense<0.000000e+00> : vector<4x8xf32>
    %62 = vector.multi_reduction <add>, %61, %cst_19 [2] : vector<4x8x8xf32> to vector<4x8xf32>
    %63 = vector.shape_cast %62 : vector<4x8xf32> to vector<4x8x1xf32>
    %cst_20 = arith.constant 1.000000e+00 : f32
    %64 = vector.broadcast %cst_20 : f32 to vector<4x8x1xf32>
    %65 = arith.divf %64, %63 : vector<4x8x1xf32>
    %66 = vector.broadcast %65 : vector<4x8x1xf32> to vector<4x8x8xf32>
    %67 = arith.mulf %61, %66 : vector<4x8x8xf32>
    %68 = arith.truncf %67 : vector<4x8x8xf32> to vector<4x8x8xbf16>
    %c0_21 = arith.constant 0 : index
    %c0_22 = arith.constant 0 : index
    %c0_23 = arith.constant 0 : index
    %c0_24 = arith.constant 0 : index
    %c0_25 = arith.constant 0 : index
    %69 = vector.load %arg19[%c0_21, %c0_22, %c0_23, %c0_24, %c0_25] : memref<1x1x4x8x8xbf16, #tpu.memory_space<vmem>>, vector<1x1x4x8x8xbf16>
    %70 = vector.shape_cast %69 : vector<1x1x4x8x8xbf16> to vector<4x8x8xbf16>
    %71 = vector.shape_cast %68 : vector<4x8x8xbf16> to vector<1x1x4x8x8xbf16>
    tpu.vector_store %arg19[%c0_21, %c0_22, %c0_23, %c0_24, %c0_25], %71 {strides = array<i32>} : memref<1x1x4x8x8xbf16, #tpu.memory_space<vmem>>, vector<1x1x4x8x8xbf16>,
    %72 = arith.truncf %67 : vector<4x8x8xf32> to vector<4x8x8xbf16>
    "tpu.trace_start"() <{level = 10 : i32, message = "hqk,hkd->hqd"}> : () -> ()
    %cst_26 = arith.constant dense<0.000000e+00> : vector<4x8x8xf32>
    %73 = tpu.matmul %72, %49, %cst_26 {dimension_numbers = #tpu.dot_dimension_numbers<[2], [1], [1], [2], [0, 0, 0, 1, 1, 2], [0], [0]>} : vector<4x8x8xbf16>, vector<4x8x8xbf16>, vector<4x8x8xf32> -> vector<4x8x8xf32>
    "tpu.trace_stop"() : () -> ()
    %74 = arith.truncf %73 : vector<4x8x8xf32> to vector<4x8x8xbf16>
    %75 = arith.index_cast %arg2 : i32 to index
    %c0_27 = arith.constant 0 : index
    %c0_28 = arith.constant 0 : index
    %c0_29 = arith.constant 0 : index
    %76 = vector.load %arg9[%75, %c0_27, %c0_28, %c0_29] : memref<2x4x8x32xbf16, #tpu.memory_space<vmem>>, vector<1x4x8x32xbf16>
    %77 = vector.shape_cast %76 : vector<1x4x8x32xbf16> to vector<4x8x32xbf16>
    "tpu.trace_start"() <{level = 10 : i32, message = "hqv,hvd->hqd"}> : () -> ()
    %cst_30 = arith.constant dense<0.000000e+00> : vector<4x8x32xf32>
    %78 = tpu.matmul %74, %77, %cst_30 {dimension_numbers = #tpu.dot_dimension_numbers<[2], [1], [1], [2], [0, 0, 0, 1, 1, 2], [0], [0]>} : vector<4x8x8xbf16>, vector<4x8x32xbf16>, vector<4x8x32xf32> -> vector<4x8x32xf32>
    "tpu.trace_stop"() : () -> ()
    %cst_31 = arith.constant dense<0.000000e+00> : vector<8x32xf32>
    %79 = vector.multi_reduction <add>, %78, %cst_31 [0] : vector<4x8x32xf32> to vector<8x32xf32>
    %80 = arith.addf %79, %4 : vector<8x32xf32>
    %81 = arith.index_cast %arg2 : i32 to index
    %c0_32 = arith.constant 0 : index
    %c0_33 = arith.constant 0 : index
    %82 = vector.load %arg10[%81, %c0_32, %c0_33] : memref<2x1x32xf32, #tpu.memory_space<vmem>>, vector<1x1x32xf32>
    %83 = vector.shape_cast %82 : vector<1x1x32xf32> to vector<1x32xf32>
    %84 = arith.index_cast %arg2 : i32 to index
    %c0_34 = arith.constant 0 : index
    %c0_35 = arith.constant 0 : index
    %85 = vector.load %arg11[%84, %c0_34, %c0_35] : memref<2x1x32xf32, #tpu.memory_space<vmem>>, vector<1x1x32xf32>
    %86 = vector.shape_cast %85 : vector<1x1x32xf32> to vector<1x32xf32>
    %cst_36 = arith.constant dense<0.000000e+00> : vector<8xf32>
    %87 = vector.multi_reduction <add>, %80, %cst_36 [1] : vector<8x32xf32> to vector<8xf32>
    %88 = vector.shape_cast %87 : vector<8xf32> to vector<8x1xf32>
    %cst_37 = arith.constant 3.200000e+01 : f32
    %89 = vector.broadcast %cst_37 : f32 to vector<8x1xf32>
    %90 = arith.divf %88, %89 : vector<8x1xf32>
    %91 = vector.broadcast %90 : vector<8x1xf32> to vector<8x32xf32>
    %92 = arith.subf %80, %91 : vector<8x32xf32>
    %93 = arith.mulf %92, %92 : vector<8x32xf32>
    %cst_38 = arith.constant dense<0.000000e+00> : vector<8xf32>
    %94 = vector.multi_reduction <add>, %93, %cst_38 [1] : vector<8x32xf32> to vector<8xf32>
    %95 = vector.shape_cast %94 : vector<8xf32> to vector<8x1xf32>
    %cst_39 = arith.constant 3.200000e+01 : f32
    %96 = vector.broadcast %cst_39 : f32 to vector<8x1xf32>
    %97 = arith.divf %95, %96 : vector<8x1xf32>
    %98 = vector.broadcast %90 : vector<8x1xf32> to vector<8x32xf32>
    %99 = arith.subf %80, %98 : vector<8x32xf32>
    %cst_40 = arith.constant 9.99999997E-7 : f32
    %100 = vector.broadcast %cst_40 : f32 to vector<8x1xf32>
    %101 = arith.addf %97, %100 : vector<8x1xf32>
    %102 = math.rsqrt %101 : vector<8x1xf32>
    %103 = vector.broadcast %102 : vector<8x1xf32> to vector<8x32xf32>
    %104 = arith.mulf %99, %103 : vector<8x32xf32>
    %105 = vector.broadcast %83 : vector<1x32xf32> to vector<8x32xf32>
    %106 = arith.mulf %104, %105 : vector<8x32xf32>
    %107 = vector.broadcast %86 : vector<1x32xf32> to vector<8x32xf32>
    %108 = arith.addf %106, %107 : vector<8x32xf32>
    %109 = arith.truncf %108 : vector<8x32xf32> to vector<8x32xbf16>
    %110 = arith.index_cast %arg2 : i32 to index
    %c0_41 = arith.constant 0 : index
    %c0_42 = arith.constant 0 : index
    %111 = vector.load %arg12[%110, %c0_41, %c0_42] : memref<2x32x64xbf16, #tpu.memory_space<vmem>>, vector<1x32x64xbf16>
    %112 = vector.shape_cast %111 : vector<1x32x64xbf16> to vector<32x64xbf16>
    %cst_43 = arith.constant dense<0.000000e+00> : vector<8x64xf32>
    %113 = tpu.matmul %109, %112, %cst_43 {dimension_numbers = #tpu.dot_dimension_numbers<[1], [0], [0], [1], [0, 0, 1, 1], [], []>} : vector<8x32xbf16>, vector<32x64xbf16>, vector<8x64xf32> -> vector<8x64xf32>
    %114 = arith.index_cast %arg2 : i32 to index
    %c0_44 = arith.constant 0 : index
    %c0_45 = arith.constant 0 : index
    %115 = vector.load %arg13[%114, %c0_44, %c0_45] : memref<2x1x64xf32, #tpu.memory_space<vmem>>, vector<1x1x64xf32>
    %116 = vector.shape_cast %115 : vector<1x1x64xf32> to vector<1x64xf32>
    %117 = vector.broadcast %116 : vector<1x64xf32> to vector<8x64xf32>
    %118 = arith.addf %113, %117 : vector<8x64xf32>
    %cst_46 = arith.constant 0.000000e+00 : f32
    %119 = vector.broadcast %cst_46 : f32 to vector<8x64xf32>
    %120 = arith.maximumf %118, %119 : vector<8x64xf32>
    %121 = arith.truncf %120 : vector<8x64xf32> to vector<8x64xbf16>
    %122 = arith.index_cast %arg2 : i32 to index
    %c0_47 = arith.constant 0 : index
    %c0_48 = arith.constant 0 : index
    %123 = vector.load %arg14[%122, %c0_47, %c0_48] : memref<2x64x32xbf16, #tpu.memory_space<vmem>>, vector<1x64x32xbf16>
    %124 = vector.shape_cast %123 : vector<1x64x32xbf16> to vector<64x32xbf16>
    %cst_49 = arith.constant dense<0.000000e+00> : vector<8x32xf32>
    %125 = tpu.matmul %121, %124, %cst_49 {dimension_numbers = #tpu.dot_dimension_numbers<[1], [0], [0], [1], [0, 0, 1, 1], [], []>} : vector<8x64xbf16>, vector<64x32xbf16>, vector<8x32xf32> -> vector<8x32xf32>
    %126 = arith.index_cast %arg2 : i32 to index
    %c0_50 = arith.constant 0 : index
    %c0_51 = arith.constant 0 : index
    %127 = vector.load %arg15[%126, %c0_50, %c0_51] : memref<2x1x32xf32, #tpu.memory_space<vmem>>, vector<1x1x32xf32>
    %128 = vector.shape_cast %127 : vector<1x1x32xf32> to vector<1x32xf32>
    %129 = vector.broadcast %128 : vector<1x32xf32> to vector<8x32xf32>
    %130 = arith.addf %125, %129 : vector<8x32xf32>
    %131 = arith.addf %130, %108 : vector<8x32xf32>
    %132 = arith.index_cast %arg2 : i32 to index
    %c0_52 = arith.constant 0 : index
    %c0_53 = arith.constant 0 : index
    %133 = vector.load %arg16[%132, %c0_52, %c0_53] : memref<2x1x32xf32, #tpu.memory_space<vmem>>, vector<1x1x32xf32>
    %134 = vector.shape_cast %133 : vector<1x1x32xf32> to vector<1x32xf32>
    %135 = arith.index_cast %arg2 : i32 to index
    %c0_54 = arith.constant 0 : index
    %c0_55 = arith.constant 0 : index
    %136 = vector.load %arg17[%135, %c0_54, %c0_55] : memref<2x1x32xf32, #tpu.memory_space<vmem>>, vector<1x1x32xf32>
    %137 = vector.shape_cast %136 : vector<1x1x32xf32> to vector<1x32xf32>
    %cst_56 = arith.constant dense<0.000000e+00> : vector<8xf32>
    %138 = vector.multi_reduction <add>, %131, %cst_56 [1] : vector<8x32xf32> to vector<8xf32>
    %139 = vector.shape_cast %138 : vector<8xf32> to vector<8x1xf32>
    %cst_57 = arith.constant 3.200000e+01 : f32
    %140 = vector.broadcast %cst_57 : f32 to vector<8x1xf32>
    %141 = arith.divf %139, %140 : vector<8x1xf32>
    %142 = vector.broadcast %141 : vector<8x1xf32> to vector<8x32xf32>
    %143 = arith.subf %131, %142 : vector<8x32xf32>
    %144 = arith.mulf %143, %143 : vector<8x32xf32>
    %cst_58 = arith.constant dense<0.000000e+00> : vector<8xf32>
    %145 = vector.multi_reduction <add>, %144, %cst_58 [1] : vector<8x32xf32> to vector<8xf32>
    %146 = vector.shape_cast %145 : vector<8xf32> to vector<8x1xf32>
    %cst_59 = arith.constant 3.200000e+01 : f32
    %147 = vector.broadcast %cst_59 : f32 to vector<8x1xf32>
    %148 = arith.divf %146, %147 : vector<8x1xf32>
    %149 = vector.broadcast %141 : vector<8x1xf32> to vector<8x32xf32>
    %150 = arith.subf %131, %149 : vector<8x32xf32>
    %cst_60 = arith.constant 9.99999997E-7 : f32
    %151 = vector.broadcast %cst_60 : f32 to vector<8x1xf32>
    %152 = arith.addf %148, %151 : vector<8x1xf32>
    %153 = math.rsqrt %152 : vector<8x1xf32>
    %154 = vector.broadcast %153 : vector<8x1xf32> to vector<8x32xf32>
    %155 = arith.mulf %150, %154 : vector<8x32xf32>
    %156 = vector.broadcast %134 : vector<1x32xf32> to vector<8x32xf32>
    %157 = arith.mulf %155, %156 : vector<8x32xf32>
    %158 = vector.broadcast %137 : vector<1x32xf32> to vector<8x32xf32>
    %159 = arith.addf %157, %158 : vector<8x32xf32>
    %c0_61 = arith.constant 0 : index
    %c0_62 = arith.constant 0 : index
    %c0_63 = arith.constant 0 : index
    %160 = vector.load %arg18[%c0_61, %c0_62, %c0_63] : memref<1x8x32xf32, #tpu.memory_space<vmem>>, vector<1x8x32xf32>
    %161 = vector.shape_cast %160 : vector<1x8x32xf32> to vector<8x32xf32>
    %162 = vector.shape_cast %159 : vector<8x32xf32> to vector<1x8x32xf32>
    tpu.vector_store %arg18[%c0_61, %c0_62, %c0_63], %162 {strides = array<i32>} : memref<1x8x32xf32, #tpu.memory_space<vmem>>, vector<1x8x32xf32>,
    return
  }
  func.func @transform_0(%arg0: i32, %arg1: i32, %arg2: i32) -> (i32, i32, i32) {
    %c0_i32 = arith.constant 0 : i32
    %c0_i32_0 = arith.constant 0 : i32
    return %arg0, %arg1, %c0_i32 : i32, i32, i32
  }
  func.func @transform_1(%arg0: i32, %arg1: i32, %arg2: i32) -> (i32, i32, i32) {
    %c0_i32 = arith.constant 0 : i32
    %c0_i32_0 = arith.constant 0 : i32
    %c0_i32_1 = arith.constant 0 : i32
    return %arg0, %c0_i32, %c0_i32_0 : i32, i32, i32
  }
  func.func @transform_2(%arg0: i32, %arg1: i32, %arg2: i32) -> (i32, i32, i32) {
    %c0_i32 = arith.constant 0 : i32
    %c0_i32_0 = arith.constant 0 : i32
    return %arg0, %arg1, %c0_i32 : i32, i32, i32
  }
  func.func @transform_3(%arg0: i32, %arg1: i32, %arg2: i32) -> (i32, i32, i32) {
    %c0_i32 = arith.constant 0 : i32
    %c0_i32_0 = arith.constant 0 : i32
    %c0_i32_1 = arith.constant 0 : i32
    %c0_i32_2 = arith.constant 0 : i32
    return %c0_i32, %c0_i32_0, %c0_i32_1 : i32, i32, i32
  }
  func.func @transform_4(%arg0: i32, %arg1: i32, %arg2: i32) -> (i32, i32, i32) {
    %c0_i32 = arith.constant 0 : i32
    %c0_i32_0 = arith.constant 0 : i32
    %c0_i32_1 = arith.constant 0 : i32
    %c0_i32_2 = arith.constant 0 : i32
    return %c0_i32, %c0_i32_0, %c0_i32_1 : i32, i32, i32
  }
  func.func @transform_5(%arg0: i32, %arg1: i32, %arg2: i32) -> (i32, i32, i32) {
    %c0_i32 = arith.constant 0 : i32
    %c0_i32_0 = arith.constant 0 : i32
    %c0_i32_1 = arith.constant 0 : i32
    %c0_i32_2 = arith.constant 0 : i32
    return %c0_i32, %c0_i32_0, %c0_i32_1 : i32, i32, i32
  }
  func.func @transform_6(%arg0: i32, %arg1: i32, %arg2: i32) -> (i32, i32, i32, i32) {
    %c0_i32 = arith.constant 0 : i32
    %c0_i32_0 = arith.constant 0 : i32
    %c0_i32_1 = arith.constant 0 : i32
    %c0_i32_2 = arith.constant 0 : i32
    %c0_i32_3 = arith.constant 0 : i32
    return %c0_i32, %c0_i32_0, %c0_i32_1, %c0_i32_2 : i32, i32, i32, i32
  }
  func.func @transform_7(%arg0: i32, %arg1: i32, %arg2: i32) -> (i32, i32, i32) {
    %c0_i32 = arith.constant 0 : i32
    %c0_i32_0 = arith.constant 0 : i32
    %c0_i32_1 = arith.constant 0 : i32
    %c0_i32_2 = arith.constant 0 : i32
    return %c0_i32, %c0_i32_0, %c0_i32_1 : i32, i32, i32
  }
  func.func @transform_8(%arg0: i32, %arg1: i32, %arg2: i32) -> (i32, i32, i32) {
    %c0_i32 = arith.constant 0 : i32
    %c0_i32_0 = arith.constant 0 : i32
    %c0_i32_1 = arith.constant 0 : i32
    %c0_i32_2 = arith.constant 0 : i32
    return %c0_i32, %c0_i32_0, %c0_i32_1 : i32, i32, i32
  }
  func.func @transform_9(%arg0: i32, %arg1: i32, %arg2: i32) -> (i32, i32, i32) {
    %c0_i32 = arith.constant 0 : i32
    %c0_i32_0 = arith.constant 0 : i32
    %c0_i32_1 = arith.constant 0 : i32
    %c0_i32_2 = arith.constant 0 : i32
    return %c0_i32, %c0_i32_0, %c0_i32_1 : i32, i32, i32
  }
  func.func @transform_10(%arg0: i32, %arg1: i32, %arg2: i32) -> (i32, i32, i32) {
    %c0_i32 = arith.constant 0 : i32
    %c0_i32_0 = arith.constant 0 : i32
    %c0_i32_1 = arith.constant 0 : i32
    %c0_i32_2 = arith.constant 0 : i32
    return %c0_i32, %c0_i32_0, %c0_i32_1 : i32, i32, i32
  }
  func.func @transform_11(%arg0: i32, %arg1: i32, %arg2: i32) -> (i32, i32, i32) {
    %c0_i32 = arith.constant 0 : i32
    %c0_i32_0 = arith.constant 0 : i32
    %c0_i32_1 = arith.constant 0 : i32
    %c0_i32_2 = arith.constant 0 : i32
    return %c0_i32, %c0_i32_0, %c0_i32_1 : i32, i32, i32
  }
  func.func @transform_12(%arg0: i32, %arg1: i32, %arg2: i32) -> (i32, i32, i32) {
    %c0_i32 = arith.constant 0 : i32
    %c0_i32_0 = arith.constant 0 : i32
    %c0_i32_1 = arith.constant 0 : i32
    %c0_i32_2 = arith.constant 0 : i32
    return %c0_i32, %c0_i32_0, %c0_i32_1 : i32, i32, i32
  }
  func.func @transform_13(%arg0: i32, %arg1: i32, %arg2: i32) -> (i32, i32, i32) {
    %c0_i32 = arith.constant 0 : i32
    %c0_i32_0 = arith.constant 0 : i32
    %c0_i32_1 = arith.constant 0 : i32
    %c0_i32_2 = arith.constant 0 : i32
    return %c0_i32, %c0_i32_0, %c0_i32_1 : i32, i32, i32
  }
  func.func @transform_14(%arg0: i32, %arg1: i32, %arg2: i32) -> (i32, i32, i32) {
    %c0_i32 = arith.constant 0 : i32
    %c0_i32_0 = arith.constant 0 : i32
    %c0_i32_1 = arith.constant 0 : i32
    %c0_i32_2 = arith.constant 0 : i32
    return %c0_i32, %c0_i32_0, %c0_i32_1 : i32, i32, i32
  }
  func.func @transform_15(%arg0: i32, %arg1: i32, %arg2: i32) -> (i32, i32, i32) {
    %c0_i32 = arith.constant 0 : i32
    %c0_i32_0 = arith.constant 0 : i32
    return %arg0, %arg1, %c0_i32 : i32, i32, i32
  }
  func.func @transform_16(%arg0: i32, %arg1: i32, %arg2: i32) -> (i32, i32, i32, i32, i32) {
    %c0_i32 = arith.constant 0 : i32
    %c0_i32_0 = arith.constant 0 : i32
    %c0_i32_1 = arith.constant 0 : i32
    return %arg0, %arg2, %c0_i32, %arg1, %c0_i32_0 : i32, i32, i32, i32, i32
  }
}

</mosaic_0001>

<bundles_post_ra>
// kernel: tpu_custom_call.1
= control target key start
LH: loop header
LB: loop body
LE: loop exit
PB: predicated region body
PF: predicated region fallthrough
CT: control target
= control target key end

     0   :  { %s3424_s0 = inlined_call_operand.hbm [shape: f32[2,8,32], index: 0, kind: input, shape index: {}]   ;;  %s3425_s1 = inlined_call_operand.hbm [shape: bf16[2,8,32], index: 1, kind: input, shape index: {}]   ;;  %s3426_s2 = inlined_call_operand.hbm [shape: bf16[2,8,8], index: 2, kind: input, shape index: {}]   ;;  %s3427_s3 = inlined_call_operand.vmem [shape: bf16[2,32,32], index: 3, kind: input, shape index: {}]   ;;  %s3428_s4 = inlined_call_operand.vmem [shape: bf16[2,32,32], index: 4, kind: input, shape index: {}]   ;;  %s3429_s5 = inlined_call_operand.vmem [shape: bf16[2,32,32], index: 5, kind: input, shape index: {}]   ;;  %s3430_s6 = inlined_call_operand.hbm [shape: bf16[2,4,8,32], index: 6, kind: input, shape index: {}]   ;;  %s3431_s7 = inlined_call_operand.vmem [shape: f32[2,1,32], index: 7, kind: input, shape index: {}]   ;;  %s3432_s8 = inlined_call_operand.vmem [shape: f32[2,1,32], index: 8, kind: input, shape index: {}]   ;;  %s3433_s9 = inlined_call_operand.hbm [shape: bf16[2,32,64], index: 9, kind: input, shape index: {}]   ;;  %s3434_s10 = inlined_call_operand.vmem [shape: f32[2,1,64], index: 10, kind: input, shape index: {}]   ;;  %s3435_s11 = inlined_call_operand.vmem [shape: bf16[2,64,32], index: 11, kind: input, shape index: {}]   ;;  %s3436_s12 = inlined_call_operand.vmem [shape: f32[2,1,32], index: 12, kind: input, shape index: {}]   ;;  %s3437_s13 = inlined_call_operand.vmem [shape: f32[2,1,32], index: 13, kind: input, shape index: {}]   ;;  %s3438_s14 = inlined_call_operand.vmem [shape: f32[2,1,32], index: 14, kind: input, shape index: {}]   ;;  %s3439_s15 = inlined_call_operand.hbm [shape: f32[2,8,32], index: 15, kind: output, shape index: {0}]   ;;  %s3440_s16 = inlined_call_operand.hbm [shape: bf16[2,2,4,8,8], index: 16, kind: output, shape index: {1}]  }
   0x1   :  { %3474 = sst [smem:[#allocation33_spill]] %s3424_s0 }
   0x2   :  { %3475 = sst [smem:[#allocation34_spill]] %s3425_s1 }
   0x3   :  { %3476 = sst [smem:[#allocation35_spill]] %s3428_s4 }
   0x4   :  { %3477 = sst [smem:[#allocation36_spill]] %s3429_s5 }
   0x5   :  { %3478 = sst [smem:[#allocation37_spill]] %s3430_s6 }
   0x6   :  { %3479 = sst [smem:[#allocation38_spill]] %s3431_s7 }
   0x7   :  { %3480 = sst [smem:[#allocation39_spill]] %s3432_s8 }
   0x8   :  { %3481 = sst [smem:[#allocation40_spill]] %s3434_s10 }
   0x9   :  { %3482 = sst [smem:[#allocation41_spill]] %s3435_s11 }
   0xa   :  { %3483 = sst [smem:[#allocation42_spill]] %s3436_s12 }
   0xb   :  { %3484 = sst [smem:[#allocation43_spill]] %s3437_s13 }
   0xc   :  { %3485 = sst [smem:[#allocation44_spill]] %s3438_s14 }
   0xd   :  { %3486 = sst [smem:[#allocation45_spill]] %s3439_s15 }
   0xe   :  { %3487 = sst [smem:[#allocation46_spill]] %s3440_s16 }
   0xf   :  { %22 = vsyncpa [#allocation3], 0 }
  0x10   :  { %24 = vsyncpa [#allocation3 + $0x1], 0 }
  0x11   :  { %25 = vsyncpa [#allocation6], 0 }
  0x12   :  { %27 = vsyncpa [#allocation6 + $0x1], 0 }
  0x13   :  { %28 = vsyncpa [#allocation9], 0 }
  0x14   :  { %29 = vsyncpa [#allocation4], 0 }
  0x15   :  { %31 = vsyncpa [#allocation4 + $0x1], 0 }
  0x16   :  { %32 = vsyncpa [#allocation13], 0 }
  0x17   :  { %34 = vsyncpa [#allocation13 + $0x1], 0  ;;  %s2818_s21 = smov 0   ;;  %s2820_s22 = smov 0  }
  0x18   :  { %s2822_s23 = smov 0   ;;  %s2824_s24 = smov 0  }
  0x19   :  { %s2826_s25 = smov 0   ;;  %s2828_s26 = smov 0  }
  0x1a   :  { %s2830_s27 = smov 0   ;;  %s2832_s28 = smov 0  }
  0x1b   :  { %s2834_s29 = smov 0   ;;  %s2836_s30 = smov 0  }
  0x1c   :  { %s2838_s0 = smov 0  }
  0x1d LB: > { %3488 = sst [smem:[#allocation19_spill]] %s2675_s21  ;;  %s2874_s17 = sadd.s32 4294967295, %s2715_s0   ;;  %s2715_s0 = sphi %s2838_s0, %s40_s0   ;;  %s2711_s30 = sphi %s2836_s30, %s3566_s30   ;;  %s2707_s29 = sphi %s2834_s29, %s3565_s29   ;;  %s2703_s28 = sphi %s2832_s28, %s3564_s28   ;;  %s2699_s27 = sphi %s2830_s27, %s3563_s27   ;;  %s2695_s26 = sphi %s2828_s26, %s3555_s26   ;;  %s2691_s25 = sphi %s2826_s25, %s3562_s25   ;;  %s2687_s24 = sphi %s2824_s24, %s3561_s24   ;;  %s2683_s23 = sphi %s2822_s23, %s3553_s23   ;;  %s2679_s22 = sphi %s2820_s22, %s3560_s22   ;;  %s2675_s21 = sphi %s2818_s21, %s3559_s21  }
  0x1e   : > { %3489 = sst [smem:[#allocation20_spill]] %s2683_s23  ;;  %s1994_s18 = sadd.s32 4294967294, %s2715_s0  }
  0x1f   : > { %3490 = sst [smem:[#allocation21_spill]] %s2687_s24  ;;  %p81_p0 = scmp.ne.s32.totalorder %s2691_s25, %s2687_s24 }
  0x20   : > { %3491 = sst [smem:[#allocation22_spill]] %s2695_s26  ;;  %p3451_p1 = scmp.eq.s32.totalorder %s2874_s17, 0 }
  0x21   : > { %3492 = sst [smem:[#allocation23_spill]] %s2703_s28  ;;  %p3452_p2 = scmp.eq.s32.totalorder %s2874_s17, 3 }
  0x22   : > { %3493 = sst [smem:[#allocation24_spill]] %s2707_s29  ;;  %p419_p3 = scmp.eq.s32.totalorder %s1994_s18, 3 }
  0x23   : > { %p2883_p4 = por %p3451_p1, %p81_p0  ;;  %p442_p6 = scmp.ne.s32.totalorder %s2683_s23, %s2679_s22 }
  0x24   : > { %p2888_p5 = por %p419_p3, %p81_p0  ;;  %p448_p7 = scmp.ne.s32.totalorder %s2679_s22, %s2675_s21 }
  0x25   : > { %s3494_s19 = scalar_select %p2883_p4, 1, 0 }
  0x26   : > { %s3495_s15 = scalar_select %p2888_p5, 1, 0 }
  0x27   : > { %p1995_p8 = scmp.ge.s32.totalorder %s2715_s0, 1  ;;  %p2899_p9 = por %p442_p6, %p3452_p2 }
  0x28   : > { %3496 = sst [smem:[#allocation25_spill]] %s3495_s15  ;;  %p456_p10 = scmp.lt.s32.totalorder %s2715_s0, 5 }
  0x29   : > { %s3497_s24 = scalar_select %p2899_p9, 1, 0 }
  0x2a   : > { %p2904_p11 = por %p448_p7, %p419_p3  ;;  %p2908_p12 = pnand %p1995_p8, %p456_p10 }
  0x2b   : > { %3498 = sst [smem:[#allocation26_spill]] %s3497_s24  ;;  %s2717_s20 = smov [#allocation8]  }
  0x2c   : > { %s3499_s18 = scalar_select %p2904_p11, 1, 0 }
  0x2d   : > { %s3501_s14 = scalar_select %p2908_p12, 1, 0 }
  0x2e   : > { %3500 = sst [smem:[#allocation27_spill]] %s3499_s18  ;;  %s477_s15 = sshll.u32 %s2717_s20, 4  ;;  %s478_s15 = int_to_ptr.vmem [resolvable:$true] %s477_s15 }
  0x2f   : > { %p2246_p13 = pneg %p2908_p12  ;;  %s3503_s6 = sld [smem:[#allocation37_spill]] }
  0x31   : > { %p2916_p0 = pnand %p2246_p13, %p3451_p1 }
  0x33   : > { %s3502_s21 = scalar_select %p2916_p0, 1, 0 }
  0x34   : > { %p3464_p6 = pneg %p2916_p0 }
  0x35   : > { %s2407_s18 = scalar_lea.hbm %s3503_s6, 512 }
  0x36   : > { %p2408_p3 = scmp.ne.s32.totalorder %s3503_s6, %s2407_s18  ;;  %p2414_p10 = scmp.lt.u32.totalorder %s2407_s18, %s3503_s6 }
  0x38   : > { %p2410_p7 = pnand %p3464_p6, %p2408_p3 }
  0x3a   : > { %p2411_p8 = pneg %p2410_p7 }
  0x3c   : > { %p2416_p13 = pnand %p2414_p10, %p2411_p8 }
  0x3e   : > { %2419 = shalt.err (!%p2416_p13)
}
  0x3f   : > { %s2420_s13 = scalar_lea.vmem %s478_s15, 512  ;;  %p2428_p5 = scmp.lt.s32.totalorder %s478_s15, %s478_s15 }
  0x40   : > { %p2421_p1 = scmp.ne.s32.totalorder %s478_s15, %s2420_s13  ;;  %p2429_p9 = scmp.lt.s32.totalorder %s2420_s13, %s2420_s13 }
  0x42   : > { %p2423_p2 = pnand %p2421_p1, %p3464_p6  ;;  %p2430_p4 = por %p2429_p9, %p2428_p5 }
  0x44   : > { %p2424_p11 = pneg %p2423_p2 }
  0x46   : > { %p2431_p12 = pnand %p2430_p4, %p2424_p11 }
  0x48   : > { %2434 = shalt.err (!%p2431_p12)
}
  0x49   : > { %s3456_s16 = smov 64   ;;  %s3457_s12 = smov 4  }
  0x4a   : > { %2249 = dma.hbm_to_vmem [thread:$0]  (!%p2916_p0), %s3503_s6, 512, %s478_s15, [#allocation9], %s3456_s16, %s3456_s16, %s3457_s12  }
  0x4b   : > { %s52_s18 = sadd.s32 1, %s2707_s29  ;;  %s59_s20 = sadd.s32 1, %s2711_s30 }
  0x4c   : > { %p53_p1 = scmp.ge.s32.totalorder %s52_s18, 2  ;;  %s68_s13 = sadd.s32 1, %s2695_s26 }
  0x4d   : > { %p75_p2 = scmp.ne.s32.totalorder %s2695_s26, %s2691_s25  ;;  %p76_p4 = scmp.eq.s32.totalorder %s2715_s0, 0 }
  0x4e   : > { %s3568_s18 = smov (%p53_p1, %s52_s18), 0  ;;  %s3570_s20 = smov (!%p53_p1, %s59_s20), %s2711_s30 }
  0x4f   : > { %3504 = sst [smem:[#allocation28_spill]] %s3568_s18  ;;  %p77_p5 = por %p76_p4, %p75_p2 }
  0x50   : > { %p3505_p9 = scmp.eq.s32.totalorder %s2874_s17, 3  ;;  %p61_p12 = scmp.ge.s32.totalorder %s3570_s20, 2 }
  0x51   : > { %s426_s24 = ssub.s32 %s2707_s29, %s3568_s18  ;;  %p2272_p3 = scmp.lt.s32.totalorder %s2715_s0, 4 }
  0x52   : > { %p2956_p11 = por %p3505_p9, %p75_p2  ;;  %s2964_s28 = sand.u32 1, %s2695_s26  }
  0x53   : > { %s3572_s20 = smov (%p61_p12, %s3570_s20), 0  ;;  %p2968_p7 = pnand %p2272_p3, %p77_p5 }
  0x54   : > { %s3506_s15 = scalar_select %p2956_p11, 1, 0 }
  0x55   : > { %3508 = sst [smem:[#allocation30_spill]] %s3572_s20  ;;  %s544_s12 = sand.u32 1, %s2715_s0  }
  0x56   : > { %3507 = sst [smem:[#allocation29_spill]] %s3506_s15  ;;  %s63_s6 = ssub.s32 %s2711_s30, %s3572_s20 }
  0x57   : > { %s3509_s16 = scalar_select %p2968_p7, 1, 0 }
  0x58   : > { %p66_p8 = scmp.eq.s32.totalorder %s63_s6, 0  ;;  %s427_s10 = sor.u32 %s426_s24, %s63_s6 }
  0x59   : > { %p430_p10 = scmp.eq.s32.totalorder %s427_s10, 0  ;;  %s3511_s18 = sadd.s32 1, %s2683_s23 }
  0x5a   : > { %s2976_s15 = scalar_select %p66_p8, %s2695_s26, %s68_s13  }
  0x5b   : > { %s2981_s29 = scalar_select %p430_p10, %s2683_s23, %s3511_s18  }
  0x5c   : > { %3510 = sst [smem:[#allocation31_spill]] %s2976_s15  ;;  %s3463_s8 = sshll.u32 %s2964_s28, 2 }
  0x5d   : > { %3512 = sst [smem:[#allocation32_spill]] %s2981_s29  ;;  %s2002_s7 = sshll.u32 %s2711_s30, 6 }
  0x5e   : > { %s3513_s1 = sld [smem:[#allocation34_spill]]  ;;  %s548_s20 = scalar_lea.vmem [#allocation5], %s3463_s8 }
  0x5f   : > { %s555_s6 = sshll.u32 %s548_s20, 4  ;;  %s2997_s18 = scalar_lea.hbm %s3426_s2, %s2002_s7  ;;  %s2992_s6 = int_to_ptr.vmem [resolvable:$true] %s555_s6 }
  0x60   : > { %s2999_s24 = scalar_lea.sflag [#allocation6], %s544_s12  ;;  %p3005_p1 = pneg %p2968_p7 }
  0x62   : > { %s3514_s5 = scalar_select %p3005_p1, 1, 0 }
  0x64   : > { %s2988_s4 = scalar_lea.hbm %s3513_s1, %s2002_s7  ;;  %s2440_s8 = scalar_lea.hbm %s3513_s1, 128 }
  0x65   : > { %s2435_s15 = scalar_lea.hbm %s2988_s4, 64  ;;  %p2441_p5 = scmp.lt.u32.totalorder %s2988_s4, %s3513_s1 }
  0x66   : > { %p2436_p13 = scmp.ne.s32.totalorder %s2988_s4, %s2435_s15  ;;  %p2442_p9 = scmp.lt.u32.totalorder %s2440_s8, %s2435_s15 }
  0x67   : > { %p2444_p3 = scmp.lt.u32.totalorder %s2435_s15, %s2988_s4 }
  0x68   : > { %p2438_p2 = pnand %p3005_p1, %p2436_p13  ;;  %p2443_p12 = por %p2442_p9, %p2441_p5 }
  0x6a   : > { %p2439_p4 = pneg %p2438_p2  ;;  %p2445_p8 = por %p2444_p3, %p2443_p12 }
  0x6c   : > { %p2446_p10 = pnand %p2445_p8, %p2439_p4 }
  0x6e   : > { %2449 = shalt.err (!%p2446_p10)
}
  0x6f   : > { %s2450_s12 = scalar_lea.vmem %s2992_s6, 64  ;;  %s2720_s13 = smov [#allocation5]  }
  0x70   : > { %p2451_p13 = scmp.ne.s32.totalorder %s2992_s6, %s2450_s12  ;;  %s2455_s11 = sshll.u32 %s2720_s13, 4  ;;  %s2456_s11 = int_to_ptr.vmem [resolvable:$false] %s2455_s11 }
  0x71   : > { %s2457_s20 = scalar_lea.vmem %s2456_s11, 128  ;;  %p2458_p11 = scmp.lt.s32.totalorder %s2992_s6, %s2456_s11 }
  0x72   : > { %p2453_p2 = pnand %p2451_p13, %p3005_p1  ;;  %p2459_p0 = scmp.lt.s32.totalorder %s2457_s20, %s2450_s12 }
  0x74   : > { %p2454_p6 = pneg %p2453_p2  ;;  %p2460_p5 = por %p2459_p0, %p2458_p11 }
  0x76   : > { %p2461_p9 = pnand %p2460_p5, %p2454_p6 }
  0x78   : > { %2464 = shalt.err (!%p2461_p9)
}
  0x79   : > { %2259 = dma.hbm_to_vmem [thread:$0]  (!%p2968_p7), %s2988_s4, 64, %s2992_s6, %s2999_s24  }
  0x7a   : > { %s2721_s8 = smov [#allocation10]   ;;  %s1999_s10 = sshll.u32 %s2964_s28, 3 }
  0x7b   : > { %s496_s15 = sshll.u32 %s2721_s8, 4  ;;  %s2465_s11 = scalar_lea.hbm %s3433_s9, 512  ;;  %s497_s15 = int_to_ptr.vmem [resolvable:$true] %s496_s15 }
  0x7c   : > { %p2466_p0 = scmp.ne.s32.totalorder %s3433_s9, %s2465_s11  ;;  %p3515_p6 = scmp.ne.s32.totalorder %s3502_s21, 0 }
  0x7d   : > { %p2472_p3 = scmp.lt.u32.totalorder %s2465_s11, %s3433_s9 }
  0x7e   : > { %p3516_p11 = pneg %p3515_p6 }
  0x80   : > { %p2468_p4 = pnand %p2466_p0, %p3516_p11 }
  0x82   : > { %p2469_p12 = pneg %p2468_p4 }
  0x84   : > { %p2474_p8 = pnand %p2472_p3, %p2469_p12 }
  0x86   : > { %2477 = shalt.err (!%p2474_p8)
}
  0x87   : > { %s2478_s4 = scalar_lea.vmem %s497_s15, 512  ;;  %p3517_p13 = pmov %p3516_p11 }
  0x88   : > { %p2479_p10 = scmp.ne.s32.totalorder %s497_s15, %s2478_s4  ;;  %p2486_p9 = scmp.lt.s32.totalorder %s497_s15, %s497_s15 }
  0x89   : > { %p2487_p7 = scmp.lt.s32.totalorder %s2478_s4, %s2478_s4 }
  0x8a   : > { %p2481_p2 = pnand %p2479_p10, %p3517_p13 }
  0x8b   : > { %p2488_p1 = por %p2487_p7, %p2486_p9 }
  0x8c   : > { %p2482_p5 = pneg %p2481_p2 }
  0x8e   : > { %p2489_p0 = pnand %p2488_p1, %p2482_p5 }
  0x90   : > { %2492 = shalt.err (!%p2489_p0)
}
  0x91   : > { %s3518_s6 = smov 4   ;;  %s3519_s8 = smov 64  }
  0x92   : > { %2252 = dma.hbm_to_vmem [thread:$0]  (!%p3515_p6), %s3433_s9, 512, %s497_s15, [#allocation9], %s3519_s8, %s3519_s8, %s3518_s6  }
  0x93   : > { %s2000_s7 = sshll.u32 %s2711_s30, 7  ;;  %s529_s13 = scalar_lea.vmem [#allocation2], %s1999_s10 }
  0x94   : > { %s537_s11 = sshll.u32 %s529_s13, 4  ;;  %s3520_s4 = sld [smem:[#allocation33_spill]]  ;;  %s538_s11 = int_to_ptr.vmem [resolvable:$true] %s537_s11 }
  0x95   : > { %s526_s21 = scalar_lea.sflag [#allocation3], %s2964_s28  ;;  %p3521_p1 = scmp.ne.s32.totalorder %s3514_s5, 0 }
  0x9a   : > { %s3057_s29 = scalar_lea.hbm %s3520_s4, %s2000_s7  ;;  %s2498_s10 = scalar_lea.hbm %s3520_s4, 256 }
  0x9b   : > { %s2493_s23 = scalar_lea.hbm %s3057_s29, 128  ;;  %p2499_p6 = scmp.lt.u32.totalorder %s3057_s29, %s3520_s4 }
  0x9c   : > { %p2494_p7 = scmp.ne.s32.totalorder %s3057_s29, %s2493_s23  ;;  %p2500_p12 = scmp.lt.u32.totalorder %s2498_s10, %s2493_s23 }
  0x9d   : > { %p2502_p8 = scmp.lt.u32.totalorder %s2493_s23, %s3057_s29 }
  0x9e   : > { %p2496_p11 = pnand %p2494_p7, %p3521_p1  ;;  %p2501_p3 = por %p2500_p12, %p2499_p6 }
  0xa0   : > { %p2497_p4 = pneg %p2496_p11  ;;  %p2503_p10 = por %p2502_p8, %p2501_p3 }
  0xa2   : > { %p2504_p13 = pnand %p2503_p10, %p2497_p4 }
  0xa4   : > { %2507 = shalt.err (!%p2504_p13)
}
  0xa5   : > { %s2508_s26 = scalar_lea.vmem %s538_s11, 128  ;;  %s2722_s7 = smov [#allocation2]  }
  0xa6   : > { %p2509_p2 = scmp.ne.s32.totalorder %s538_s11, %s2508_s26  ;;  %s2513_s13 = sshll.u32 %s2722_s7, 4  ;;  %s2514_s13 = int_to_ptr.vmem [resolvable:$false] %s2513_s13 }
  0xa7   : > { %s2515_s12 = scalar_lea.vmem %s2514_s13, 256  ;;  %p2516_p0 = scmp.lt.s32.totalorder %s538_s11, %s2514_s13 }
  0xa8   : > { %p2511_p5 = pnand %p2509_p2, %p3521_p1  ;;  %p2517_p7 = scmp.lt.s32.totalorder %s2515_s12, %s2508_s26 }
  0xaa   : > { %p2512_p9 = pneg %p2511_p5  ;;  %p2518_p11 = por %p2517_p7, %p2516_p0 }
  0xac   : > { %p2519_p6 = pnand %p2518_p11, %p2512_p9 }
  0xae   : > { %2522 = shalt.err (!%p2519_p6)
}
  0xaf   : > { %p3522_p12 = scmp.ne.s32.totalorder %s3509_s16, 0  ;;  %s3523_s23 = sshll.u32 %s2964_s28, 2 }
  0xb0   : > { %s566_s20 = scalar_lea.vmem [#allocation7], %s3523_s23  ;;  %s2523_s6 = scalar_lea.hbm %s2997_s18, 64 }
  0xb1   : > { %2256 = dma.hbm_to_vmem [thread:$0]  (!%p3522_p12), %s3057_s29, 128, %s538_s11, %s526_s21  }
  0xb2   : > { %s574_s15 = sshll.u32 %s566_s20, 4  ;;  %p2524_p4 = scmp.ne.s32.totalorder %s2997_s18, %s2523_s6  ;;  %s575_s15 = int_to_ptr.vmem [resolvable:$true] %s574_s15 }
  0xb3   : > { %s2528_s1 = scalar_lea.hbm %s3426_s2, 128  ;;  %p2529_p10 = scmp.lt.u32.totalorder %s2997_s18, %s3426_s2 }
  0xb4   : > { %p2526_p3 = pnand %p2524_p4, %p3521_p1  ;;  %p2530_p13 = scmp.lt.u32.totalorder %s2528_s1, %s2523_s6 }
  0xb5   : > { %p2532_p5 = scmp.lt.u32.totalorder %s2523_s6, %s2997_s18 }
  0xb6   : > { %p2527_p8 = pneg %p2526_p3  ;;  %p2531_p2 = por %p2530_p13, %p2529_p10 }
  0xb8   : > { %p2533_p9 = por %p2532_p5, %p2531_p2 }
  0xba   : > { %p2534_p0 = pnand %p2533_p9, %p2527_p8 }
  0xbc   : > { %2537 = shalt.err (!%p2534_p0)
}
  0xbd   : > { %s2538_s29 = scalar_lea.vmem %s575_s15, 64  ;;  %s2723_s28 = smov [#allocation7]  }
  0xbe   : > { %p2539_p7 = scmp.ne.s32.totalorder %s575_s15, %s2538_s29  ;;  %s2543_s11 = sshll.u32 %s2723_s28, 4  ;;  %s2544_s11 = int_to_ptr.vmem [resolvable:$false] %s2543_s11 }
  0xbf   : > { %s2545_s21 = scalar_lea.vmem %s2544_s11, 128  ;;  %p2546_p4 = scmp.lt.s32.totalorder %s575_s15, %s2544_s11 }
  0xc0   : > { %p2541_p11 = pnand %p2539_p7, %p3521_p1  ;;  %p2547_p3 = scmp.lt.s32.totalorder %s2545_s21, %s2538_s29 }
  0xc2   : > { %p2542_p6 = pneg %p2541_p11  ;;  %p2548_p12 = por %p2547_p3, %p2546_p4 }
  0xc4   : > { %p2549_p10 = pnand %p2548_p12, %p2542_p6 }
  0xc6   : > { %2552 = shalt.err (!%p2549_p10)
}
  0xc7   : > { %p3524_p13 = scmp.ne.s32.totalorder %s3509_s16, 0  ;;  %p3525_p8 = scmp.ne.s32.totalorder %s3501_s14, 0 }
  0xc8   : > { %s3100_s5 = sand.u32 (!%p3525_p8), 1, %s2691_s25   ;;  %p3526_p1 = scmp.ne.s32.totalorder (!%p3525_p8), %s3494_s19, 0 }
  0xc9   : > { %2262 = dma.hbm_to_vmem [thread:$0]  (!%p3524_p13), %s2997_s18, 64, %s575_s15, %s2999_s24  }
  0xca   : > { %583 = sbr.rel (%p3525_p8) target bundleno = 2626 (0xa42), region = 80  ;;  %s2006_s13 = sshll.u32 (!%p3525_p8), %s3100_s5, 3 }
  0xcb   : > { %s586_s12 = scalar_lea.sflag (!%p3525_p8), [#allocation3], %s3100_s5  ;;  %s589_s23 = scalar_lea.vmem (!%p3525_p8), [#allocation2], %s2006_s13 }
  0xd1   : > { %2654 = dma.done.wait (%p3526_p1), %s586_s12, 128  }
  0xd2   : > { %2656 = vsyncadd (%p3526_p1), %s586_s12, 4294967168  ;;  %s594_s16 = sand.u32 1, %s2874_s17   ;;  %s2007_s14 = sshll.u32 %s3100_s5, 2 }
  0xd3   : > { %s595_s18 = scalar_lea.sflag [#allocation6], %s594_s16  ;;  %s3110_s24 = scalar_lea.vmem [#allocation5], %s2007_s14 }
  0xd4   : > { %2658 = dma.done.wait (%p3526_p1), %s595_s18, 128  }
  0xd5   : > { %2660 = vsyncadd (%p3526_p1), %s595_s18, 4294967168  ;;  %s3116_s20 = scalar_lea.vmem [#allocation7], %s2007_s14  ;;  %p3527_p12 = scmp.eq.s32.totalorder %s2874_s17, 0 }
  0xd7   : > { %2662 = dma.done.wait (%p3527_p12), [#allocation9], 1024   ;;  %p3528_p2 = pmov %p3527_p12 }
  0xd8   : > { %s676_s15 = sand.u32 1, %s2679_s22   ;;  %s3125_s10 = scalar_lea.vmem [#allocation11], %s2006_s13 }
  0xd9   : > { %2664 = vsyncadd (%p3528_p2), [#allocation9], 4294966272  ;;  %s2012_s6 = sshll.u32 %s676_s15, 4  ;;  %p2013_p5 = scmp.ne.s32.totalorder %s2699_s27, 0 }
  0xda   : > { %s3127_s8 = scalar_lea.vmem [#allocation12], %s2012_s6  ;;  %v684_v0 = vld [vmem:[%s589_s23] sm:$0xff] (!%p2013_p5)  ;;  %vm685_vm0 = vcmask (!%p2013_p5), 261120  }
  0xdb   : > { %683 = sbr.rel (%p2013_p5) target bundleno = 226 (0xe2), region = 104  ;;  %686 = vst.msk [vmem:[%s3125_s10] sm:$0xff] (!%p2013_p5), %vm685_vm0, %v684_v0 }
  0xe2 PF: > { %s3132_s17 = sshll.u32 %s2699_s27, 4  ;;  %v2724_v1 = vmov 0.0   ;;  %vm2725_vm1 = vmmov 0   ;;  %v3145_v3 = vld [vmem:[%s3125_s10] sm:$0xff]  ;;  %s3529_s28 = sld [smem:[#allocation35_spill]]  ;;  %vm709_vm2 = vcmask 261120  }
  0xe3   : > { %2112 = vmatprep.subr.bf16.mxu1 %v2724_v1  ;;  %s692_s26 = scalar_lea.vmem %s3427_s3, %s3132_s17  ;;  %2116 = vmatprep.mubr.msk.bf16.mxu1 %vm2725_vm1, %v2724_v1  ;;  %v689_v5 = vpack.c.bf16 %v3145_v3, %v3145_v3  ;;  %v688_v8 = vld [vmem:[%s3110_s24] sm:$0xf]  ;;  %s3530_s12 = sld [smem:[#allocation36_spill]]  ;;  %vm898_vm3 = vcmask 64512   ;;  %vm1143_vm4 = vcmask 1043456   ;;  %vm1135_vm5 = vcmask 60416  }
  0xe4   : > { %v2375_v2 = vld [vmem:[%s692_s26] sm:$0xff]   ;;  %2128 = vmatprep.subr.bf16.mxu0 %v2724_v1  ;;  %2132 = vmatprep.mubr.msk.bf16.mxu0 %vm2725_vm1, %v2724_v1  ;;  %v2376_v4 = vld [vmem:[%s692_s26 + $0x8] sm:$0xff]   ;;  %s2726_s16 = smov 120   ;;  %s2727_s14 = smov 104   ;;  %v896_v37 = vld [vmem:[%s3116_s20] sm:$0xf] }
  0xe5   : > { %2113 = vmatpush3.bf16.msra.mxu1 %v2375_v2  ;;  %s2728_s18 = smov 112   ;;  %v897_v38 = vunpack.c.l.bf16 %v896_v37  ;;  %s3229_s24 = scalar_lea.vmem [#allocation8], %s3132_s17  ;;  %vm1674_vm6 = vcmask 523264  }
  0xe6   : > { %2114 = vmatprep.subr.bf16.mxu1 %v2724_v1  ;;  %v1331_v37 = vld [vmem:[%s3229_s24] sm:$0xf]  ;;  %s1561_s20 = scalar_lea.vmem [#allocation10], %s3132_s17  ;;  %s2070_s6 = sshll.u32 %s2699_s27, 5 }
  0xe7   : > { %s3531_s26 = sld [smem:[#allocation41_spill]]  ;;  %s3535_s19 = sld [smem:[#allocation42_spill]] }
  0xe8   : > { %s755_s11 = scalar_lea.vmem %s3529_s28, %s3132_s17  ;;  %s3532_s28 = sld [smem:[#allocation38_spill]] }
  0xe9   : > { %2115 = vmatpush3.bf16.msra.mxu1 %v2376_v4  ;;  %v2377_v6 = vld [vmem:[%s755_s11] sm:$0xff]   ;;  %v2378_v7 = vld [vmem:[%s755_s11 + $0x8] sm:$0xff]   ;;  %s817_s23 = scalar_lea.vmem %s3530_s12, %s3132_s17  ;;  %s3533_s12 = sld [smem:[#allocation39_spill]] }
  0xea   : > { %2120 = vmatprep.subr.bf16.mxu1 %v2724_v1  ;;  %v2379_v9 = vld [vmem:[%s817_s23] sm:$0xff]   ;;  %v2380_v10 = vld [vmem:[%s817_s23 + $0x8] sm:$0xff]   ;;  %s2060_s17 = sshll.u32 %s2699_s27, 2  ;;  %s1787_s21 = sshll.u32 %s3127_s8, 4  ;;  %s3315_s21 = int_to_ptr.vmem [resolvable:$true] %s1787_s21 }
  0xeb   : > { %2129 = vmatpush3.bf16.msra.mxu0 %v2379_v9 }
  0xec   : > { %2117 = vmatmul.mubr.msk.bf16.vlgmr.msra.gmra.mrb[0].mxu1 %vm709_vm2, %v689_v5  ;;  %2130 = vmatprep.subr.bf16.mxu0 %v2724_v1 }
  0xed   : > { %2121 = vmatpush3.bf16.msra.mxu1 %v2377_v6  ;;  %2124 = vmatprep.mubr.msk.bf16.mxu1 %vm2725_vm1, %v2724_v1  ;;  %s1633_s7 = scalar_lea.vmem %s3531_s26, %s2070_s6  ;;  %s1642_s1 = scalar_lea.vmem %s3535_s19, %s2699_s27 }
  0xee   : > { %2122 = vmatprep.subr.bf16.mxu1 %v2724_v1  ;;  %s1527_s11 = scalar_lea.vmem %s3532_s28, %s2699_s27  ;;  %s3536_s26 = sld [smem:[#allocation23_spill]] }
  0xef   : > { %2131 = vmatpush3.bf16.msra.mxu0 %v2380_v10  ;;  %s1529_s23 = scalar_lea.vmem %s3533_s12, %s2699_s27 }
  0xf0   : > { %2142 = vmatprep.subr.bf16.mxu0 %v2724_v1 }
  0xf1   : > { %2123 = vmatpush3.bf16.msra.mxu1 %v2378_v7 }
  0xf2   : > { %2136 = vmatprep.subr.bf16.mxu1 %v2724_v1  ;;  %2133 = vmatmul.mubr.msk.bf16.vlgmr.msra.gmra.mrb[0].mxu0 %vm709_vm2, %v688_v8 }
  0xf3   : > { %2144 = vmatprep.mubr.msk.bf16.mxu0 %vm2725_vm1, %v2724_v1 }
  0xf4   : > { %2125 = vmatmul.mubr.msk.bf16.vlgmr.msra.gmra.mrb[4].mxu1 %vm709_vm2, %v688_v8  ;;  %s2061_s29 = sshll.u32 %s3536_s26, 3 }
  0xf5   : > { %2138 = vmatprep.mubr.msk.bf16.mxu1 %vm2725_vm1, %v2724_v1  ;;  %s1784_s28 = sadd.s32 %s2061_s29, %s2060_s17 }
 0x1bf   : > { %v747_v11 = vpop.f32.mrb[0].mxu1 }
 0x1c0   : > { %v753_v12 = vpack.c.bf16 %v747_v11, %v747_v11  ;;  %v2118_v13 = vpop.f32.mrb[1].mxu1 }
 0x1c1   : > { %v750_v14 = vpop.f32.mrb[2].mxu1 }
 0x1c2   : > { %876 = vrot.lane.b32.xlu1 %v753_v12, %s2726_s16  ;;  %v2119_v15 = vpop.f32.mrb[3].mxu1 }
 0x1c5   : > { %v868_v31 = vpop.f32.mrb[0].mxu0 }
 0x1c6   : > { %v3199_v32 = vpack.c.bf16 %v868_v31, %v868_v31  ;;  %v2134_v33 = vpop.f32.mrb[1].mxu0 }
 0x1c7   : > { %v809_v16 = vpop.f32.mrb[4].mxu1  ;;  %v871_v34 = vpop.f32.mrb[2].mxu0 }
 0x1c8   : > { %v815_v17 = vpack.c.bf16 %v809_v16, %v809_v16  ;;  %v2126_v18 = vpop.f32.mrb[5].mxu1  ;;  %v2135_v35 = vpop.f32.mrb[3].mxu0  ;;  %v1145_v36 = vsel %vm1143_vm4, %v3199_v32, 0 }
 0x1c9   : > { %v812_v19 = vpop.f32.mrb[6].mxu1 }
 0x1ca   : > { %887 = vrot.lane.b32.xlu1 %v815_v17, %s2727_s14  ;;  %883 = vrot.lane.b32.xlu0 %v815_v17, %s2726_s16  ;;  %v2127_v20 = vpop.f32.mrb[7].mxu1  ;;  %v903_v21 = vsel %vm898_vm3, %v815_v17, 0 }
 0x1cb   : > { %2137 = vmatpush3.bf16.xpose.msra.mxu1 %v903_v21 }
 0x1cc   : > { %2148 = vmatprep.subr.bf16.mxu1 %v2724_v1 }
 0x1ce   : > { %880 = vrot.lane.b32.xlu1 %v753_v12, %s2727_s14  ;;  %885 = vrot.lane.b32.xlu0 %v815_v17, %s2728_s18 }
 0x1d2   : > { %878 = vrot.lane.b32.xlu0 %v753_v12, %s2728_s18  ;;  %2139 = vmatmul.mubr.msk.bf16.vlgmr.msra.gmra.mrb[8].mxu1 %vm898_vm3, %v753_v12 }
 0x1d3   : > { %2150 = vmatprep.mubr.msk.bf16.mxu1 %vm2725_vm1, %v2724_v1 }
 0x234   : > { %v877_v24 = vpop.permute.xlu1 %876 }
 0x23c   : > { %v884_v22 = vpop.permute.xlu0 %883  ;;  %v888_v27 = vpop.permute.xlu1 %887 }
 0x23d   : > { %v949_v23 = vsel %vm898_vm3, %v884_v22, 0  ;;  %v1041_v28 = vsel %vm898_vm3, %v888_v27, 0 }
 0x23e   : > { %2143 = vmatpush3.bf16.xpose.msra.mxu0 %v949_v23 }
 0x23f   : > { %2154 = vmatprep.subr.bf16.mxu0 %v2724_v1 }
 0x240   : > { %v886_v25 = vpop.permute.xlu0 %885  ;;  %v881_v30 = vpop.permute.xlu1 %880 }
 0x241   : > { %v995_v26 = vsel %vm898_vm3, %v886_v25, 0 }
 0x242   : > { %2149 = vmatpush3.bf16.xpose.msra.mxu1 %v995_v26 }
 0x243   : > { %2160 = vmatprep.subr.bf16.mxu1 %v2724_v1 }
 0x244   : > { %v879_v29 = vpop.permute.xlu0 %878 }
 0x245   : > { %2145 = vmatmul.mubr.msk.bf16.vlgmr.msra.gmra.mrb[4].mxu0 %vm898_vm3, %v877_v24 }
 0x246   : > { %2155 = vmatpush3.bf16.xpose.msra.mxu0 %v1041_v28  ;;  %2156 = vmatprep.mubr.msk.bf16.mxu0 %vm2725_vm1, %v2724_v1 }
 0x247   : > { %2166 = vmatprep.subr.bf16.mxu0 %v2724_v1 }
 0x249   : > { %2151 = vmatmul.mubr.msk.bf16.vlgmr.msra.gmra.mrb[12].mxu1 %vm898_vm3, %v879_v29 }
 0x24a   : > { %2162 = vmatprep.mubr.msk.bf16.mxu1 %vm2725_vm1, %v2724_v1  ;;  %2161 = vmatpush3.bf16.msra.mxu1 %v1145_v36 }
 0x24b   : > { %2172 = vmatprep.subr.bf16.mxu1 %v2724_v1 }
 0x24d   : > { %2157 = vmatmul.mubr.msk.bf16.vlgmr.msra.gmra.mrb[8].mxu0 %vm898_vm3, %v881_v30 }
 0x24e   : > { %2168 = vmatprep.mubr.msk.bf16.mxu0 %vm2725_vm1, %v2724_v1 }
 0x2a5   : > { %v939_v39 = vpop.f32.mrb[8].mxu1 }
 0x2a6   : > { %v940_v40 = vadd.f32 %v939_v39, %v897_v38  ;;  %v2140_v41 = vpop.f32.mrb[9].mxu1 }
 0x2a7   : > { %v942_v42 = vpop.f32.mrb[10].mxu1  ;;  %v1339_v41 = vsel %vm1143_vm4, %v1331_v37, 0 }
 0x2a8   : > { %v2141_v43 = vpop.f32.mrb[11].mxu1  ;;  %v1083_v44 = vsel %vm898_vm3, %v940_v40, -inf }
 0x2a9   : > { %1084 = vmax.xlane.f32.xlu0 %v1083_v44  ;;  %v1332_v43 = vld [vmem:[%s3229_s24 + $0x4] sm:$0xf] }
 0x318   : > { %v985_v45 = vpop.f32.mrb[4].mxu0 }
 0x319   : > { %v986_v46 = vadd.f32 %v985_v45, %v897_v38  ;;  %v2146_v47 = vpop.f32.mrb[5].mxu0 }
 0x31a   : > { %v988_v48 = vpop.f32.mrb[6].mxu0  ;;  %v1333_v47 = vld [vmem:[%s3229_s24 + $0x8] sm:$0xf] }
 0x31b   : > { %v2147_v49 = vpop.f32.mrb[7].mxu0  ;;  %v1086_v50 = vsel %vm898_vm3, %v986_v46, -inf }
 0x31c   : > { %1087 = vmax.xlane.f32.xlu1 %v1086_v50  ;;  %v1031_v51 = vpop.f32.mrb[12].mxu1 }
 0x31d   : > { %v1032_v52 = vadd.f32 %v1031_v51, %v897_v38  ;;  %v2152_v53 = vpop.f32.mrb[13].mxu1  ;;  %v1431_v51 = vsel %vm1143_vm4, %v1333_v47, 0 }
 0x31e   : > { %v1034_v54 = vpop.f32.mrb[14].mxu1 }
 0x31f   : > { %v2153_v55 = vpop.f32.mrb[15].mxu1  ;;  %v1089_v56 = vsel %vm898_vm3, %v1032_v52, -inf  ;;  %v1334_v54 = vld [vmem:[%s3229_s24 + $0xc] sm:$0xf] }
 0x320   : > { %v1077_v57 = vpop.f32.mrb[8].mxu0  ;;  %1090 = vmax.xlane.f32.xlu0 %v1089_v56 }
 0x321   : > { %v1078_v58 = vadd.f32 %v1077_v57, %v897_v38  ;;  %v2158_v59 = vpop.f32.mrb[9].mxu0 }
 0x322   : > { %v1080_v60 = vpop.f32.mrb[10].mxu0 }
 0x323   : > { %v2159_v61 = vpop.f32.mrb[11].mxu0  ;;  %v1092_v62 = vsel %vm898_vm3, %v1078_v58, -inf }
 0x324   : > { %1093 = vmax.xlane.f32.xlu0 %v1092_v62 }
 0x32d   : > { %890 = vrot.lane.b32.xlu1 %v3199_v32, %s2726_s16 }
 0x336   : > { %v1085_v63 = vpop.xlane.xlu0 %1084 }
 0x337   : > { %v1095_v0 = vsub.f32 %v940_v40, %v1085_v63 }
 0x339   : > { %v1099_v2 = vmul.f32 1.442695, %v1095_v0 }
 0x33b   : > { %2387 = vpow2.f32 %v1099_v2 }
 0x345   : > { %v2388_v4 = vpop.eup %2387 }
 0x346   : > { %v1107_v5 = vsel %vm898_vm3, %v2388_v4, 0.0 }
 0x351   : > { %1108 = vadd.xlane.f32.xlu1 %v1107_v5 }
 0x3a9   : > { %v1088_v6 = vpop.xlane.xlu1 %1087 }
 0x3aa   : > { %v1096_v7 = vsub.f32 %v986_v46, %v1088_v6  ;;  %v1385_v46 = vsel %vm1143_vm4, %v1332_v43, 0 }
 0x3ac   : > { %v1101_v8 = vmul.f32 1.442695, %v1096_v7 }
 0x3ad   : > { %v891_v9 = vpop.permute.xlu1 %890  ;;  %v1091_v10 = vpop.xlane.xlu0 %1090 }
 0x3ae   : > { %2389 = vpow2.f32 %v1101_v8  ;;  %v1191_v11 = vsel %vm1143_vm4, %v891_v9, 0  ;;  %v1097_v12 = vsub.f32 %v1032_v52, %v1091_v10 }
 0x3af   : > { %2167 = vmatpush3.bf16.msra.mxu0 %v1191_v11 }
 0x3b0   : > { %v1103_v13 = vmul.f32 1.442695, %v1097_v12  ;;  %2178 = vmatprep.subr.bf16.mxu0 %v2724_v1 }
 0x3b1   : > { %v1094_v14 = vpop.xlane.xlu0 %1093 }
 0x3b2   : > { %2391 = vpow2.f32 %v1103_v13  ;;  %v1098_v15 = vsub.f32 %v1078_v58, %v1094_v14  ;;  %v1477_v58 = vsel %vm1143_vm4, %v1334_v54, 0 }
 0x3b4   : > { %v1105_v16 = vmul.f32 1.442695, %v1098_v15 }
 0x3b6   : > { %2393 = vpow2.f32 %v1105_v16 }
 0x3b8   : > { %v2390_v17 = vpop.eup %2389 }
 0x3b9   : > { %v1110_v18 = vsel %vm898_vm3, %v2390_v17, 0.0 }
 0x3ba   : > { %1111 = vadd.xlane.f32.xlu0 %v1110_v18 }
 0x3bc   : > { %v2392_v19 = vpop.eup %2391 }
 0x3bd   : > { %v1113_v20 = vsel %vm898_vm3, %v2392_v19, 0.0 }
 0x3be   : > { %1114 = vadd.xlane.f32.xlu1 %v1113_v20 }
 0x3c0   : > { %v2394_v21 = vpop.eup %2393 }
 0x3c1   : > { %v1116_v22 = vsel %vm898_vm3, %v2394_v21, 0.0 }
 0x3c2   : > { %1117 = vadd.xlane.f32.xlu0 %v1116_v22 }
 0x3cf   : > { %894 = vrot.lane.b32.xlu1 %v3199_v32, %s2727_s14 }
 0x3d8   : > { %892 = vrot.lane.b32.xlu0 %v3199_v32, %s2728_s18  ;;  %s3534_s18 = sld [smem:[#allocation40_spill]] }
 0x3de   : > { %v1109_v23 = vpop.xlane.xlu1 %1108  ;;  %s1566_s24 = scalar_lea.vmem %s3534_s18, %s2699_s27  ;;  %s3319_s18 = scalar_lea.sflag [#allocation13], %s676_s15 }
 0x3df   : > { %2395 = vrcp.f32 %v1109_v23  ;;  %v2043_v54 = vld [vmem:[%s1566_s24] ss:$0 sm:$0xff]  ;;  %s2553_s24 = scalar_lea.vmem %s3315_s21, 256 }
 0x3e0   : > { %p2554_p9 = scmp.ne.s32.totalorder %s3315_s21, %s2553_s24 }
 0x3e9   : > { %v2396_v24 = vpop.eup %2395 }
 0x3ea   : > { %v1127_v25 = vmul.f32 %v2396_v24, %v2388_v4 }
 0x3ec   : > { %v1131_v26 = vpack.c.bf16 %v1127_v25, %v1127_v25 }
 0x3ee   : > { %1136 = vst.msk [vmem:[%s3127_s8] sm:$0xf] %vm1135_vm5, %v1131_v26  ;;  %2163 = vmatmul.mubr.msk.bf16.vlgmr.msra.gmra.mrb[16].mxu1 %vm898_vm3, %v1131_v26 }
 0x3ef   : > { %2174 = vmatprep.mubr.msk.bf16.mxu1 %vm2725_vm1, %v2724_v1 }
 0x447   : > { %v1112_v27 = vpop.xlane.xlu0 %1111 }
 0x448   : > { %2397 = vrcp.f32 %v1112_v27 }
 0x44b   : > { %v1115_v28 = vpop.xlane.xlu1 %1114 }
 0x44c   : > { %2399 = vrcp.f32 %v1115_v28 }
 0x44f   : > { %v1118_v29 = vpop.xlane.xlu0 %1117  ;;  %v895_v33 = vpop.permute.xlu1 %894 }
 0x450   : > { %2401 = vrcp.f32 %v1118_v29  ;;  %v1283_v39 = vsel %vm1143_vm4, %v895_v33, 0 }
 0x452   : > { %v2398_v30 = vpop.eup %2397 }
 0x453   : > { %v1128_v31 = vmul.f32 %v2398_v30, %v2390_v17  ;;  %v893_v32 = vpop.permute.xlu0 %892 }
 0x454   : > { %v1237_v34 = vsel %vm1143_vm4, %v893_v32, 0 }
 0x455   : > { %2173 = vmatpush3.bf16.msra.mxu1 %v1237_v34  ;;  %v1132_v35 = vpack.c.bf16 %v1128_v31, %v1128_v31 }
 0x456   : > { %v2400_v36 = vpop.eup %2399  ;;  %2184 = vmatprep.subr.bf16.mxu1 %v2724_v1 }
 0x457   : > { %v1129_v38 = vmul.f32 %v2400_v36, %v2392_v19  ;;  %1137 = vst.msk [vmem:[%s3127_s8 + $0x4] sm:$0xf] %vm1135_vm5, %v1132_v35  ;;  %2169 = vmatmul.mubr.msk.bf16.vlgmr.msra.gmra.mrb[12].mxu0 %vm898_vm3, %v1132_v35 }
 0x458   : > { %2179 = vmatpush3.bf16.msra.mxu0 %v1283_v39  ;;  %2180 = vmatprep.mubr.msk.bf16.mxu0 %vm2725_vm1, %v2724_v1  ;;  %v2381_v39 = vld [vmem:[%s1561_s20] sm:$0xff]  }
 0x459   : > { %v1133_v40 = vpack.c.bf16 %v1129_v38, %v1129_v38  ;;  %2190 = vmatprep.subr.bf16.mxu0 %v2724_v1 }
 0x45a   : > { %v2402_v42 = vpop.eup %2401 }
 0x45b   : > { %v1130_v44 = vmul.f32 %v2402_v42, %v2394_v21  ;;  %1138 = vst.msk [vmem:[%s3127_s8 + $0x8] sm:$0xf] %vm1135_vm5, %v1133_v40  ;;  %2175 = vmatmul.mubr.msk.bf16.vlgmr.msra.gmra.mrb[20].mxu1 %vm898_vm3, %v1133_v40  ;;  %v2382_v40 = vld [vmem:[%s1561_s20 + $0x8] sm:$0xff]   ;;  %s2729_s20 = smov [#allocation12]  }
 0x45c   : > { %2185 = vmatpush3.bf16.msra.mxu1 %v1339_v41  ;;  %2186 = vmatprep.mubr.msk.bf16.mxu1 %vm2725_vm1, %v2724_v1  ;;  %v2384_v41 = vld [vmem:[%s1633_s7 + $0x8] sm:$0xff]  }
 0x45d   : > { %v1134_v45 = vpack.c.bf16 %v1130_v44, %v1130_v44  ;;  %2196 = vmatprep.subr.bf16.mxu1 %v2724_v1 }
 0x45f   : > { %1139 = vst.msk [vmem:[%s3127_s8 + $0xc] sm:$0xf] %vm1135_vm5, %v1134_v45  ;;  %2181 = vmatmul.mubr.msk.bf16.vlgmr.msra.gmra.mrb[16].mxu0 %vm898_vm3, %v1134_v45  ;;  %s2557_s8 = sshll.u32 %s2729_s20, 4  ;;  %s2558_s8 = int_to_ptr.vmem [resolvable:$false] %s2557_s8 }
 0x460   : > { %2191 = vmatpush3.bf16.msra.mxu0 %v1385_v46  ;;  %2192 = vmatprep.mubr.msk.bf16.mxu0 %vm2725_vm1, %v2724_v1  ;;  %v2040_v46 = vld [vmem:[%s1527_s11] ss:$0 sm:$0xff]  ;;  %s2062_s11 = sshll.u32 %s1784_s28, 6  ;;  %s2559_s6 = scalar_lea.vmem %s2558_s8, 512 }
 0x461   : > { %2202 = vmatprep.subr.bf16.mxu0 %v2724_v1  ;;  %p2560_p6 = scmp.lt.s32.totalorder %s3315_s21, %s2558_s8  ;;  %p2561_p4 = scmp.lt.s32.totalorder %s2559_s6, %s2553_s24 }
 0x463   : > { %p2562_p3 = por %p2561_p4, %p2560_p6 }
 0x4c1   : > { %v1181_v48 = vpop.f32.mrb[16].mxu1 }
 0x4c2   : > { %v1325_v49 = vpack.c.bf16 %v1181_v48, %v1181_v48  ;;  %v2164_v50 = vpop.f32.mrb[17].mxu1  ;;  %v2041_v48 = vld [vmem:[%s1529_s23] ss:$0 sm:$0xff]  ;;  %s3538_s23 = sld [smem:[#allocation46_spill]] }
 0x4c3   : > { %v1184_v52 = vpop.f32.mrb[18].mxu1 }
 0x4c4   : > { %v2165_v53 = vpop.f32.mrb[19].mxu1  ;;  %2187 = vmatmul.mubr.msk.bf16.vlgmr.msra.gmra.mrb[24].mxu1 %vm898_vm3, %v1325_v49  ;;  %v2385_v52 = vld [vmem:[%s1633_s7 + $0x10] sm:$0xff]  }
 0x4c5   : > { %2197 = vmatpush3.bf16.msra.mxu1 %v1431_v51  ;;  %2198 = vmatprep.mubr.msk.bf16.mxu1 %vm2725_vm1, %v2724_v1  ;;  %v2386_v53 = vld [vmem:[%s1633_s7 + $0x18] sm:$0xff]  }
 0x4c6   : > { %2208 = vmatprep.subr.bf16.mxu1 %v2724_v1 }
 0x4c8   : > { %s3539_s16 = smov %s3538_s23  ;;  %s3313_s14 = scalar_lea.hbm %s3538_s23, %s2062_s11 }
 0x52a   : > { %v1227_v55 = vpop.f32.mrb[12].mxu0 }
 0x52b   : > { %v1326_v56 = vpack.c.bf16 %v1227_v55, %v1227_v55  ;;  %v2170_v57 = vpop.f32.mrb[13].mxu0 }
 0x52c   : > { %v1230_v59 = vpop.f32.mrb[14].mxu0 }
 0x52d   : > { %v2171_v60 = vpop.f32.mrb[15].mxu0  ;;  %2193 = vmatmul.mubr.msk.bf16.vlgmr.msra.gmra.mrb[20].mxu0 %vm898_vm3, %v1326_v56 }
 0x52e   : > { %v1273_v61 = vpop.f32.mrb[20].mxu1  ;;  %2203 = vmatpush3.bf16.msra.mxu0 %v1477_v58  ;;  %2204 = vmatprep.mubr.msk.bf16.mxu0 %vm2725_vm1, %v2724_v1 }
 0x52f   : > { %v1327_v62 = vpack.c.bf16 %v1273_v61, %v1273_v61  ;;  %v2176_v63 = vpop.f32.mrb[21].mxu1  ;;  %2216 = vmatprep.subr.bf16.mxu0 %v2724_v1 }
 0x530   : > { %v1276_v0 = vpop.f32.mrb[22].mxu1 }
 0x531   : > { %v2177_v2 = vpop.f32.mrb[23].mxu1  ;;  %2199 = vmatmul.mubr.msk.bf16.vlgmr.msra.gmra.mrb[28].mxu1 %vm898_vm3, %v1327_v62 }
 0x532   : > { %v1319_v4 = vpop.f32.mrb[16].mxu0  ;;  %2212 = vmatprep.mubr.msk.bf16.mxu1 %vm2725_vm1, %v2724_v1  ;;  %2209 = vmatpush3.bf16.msra.mxu1 %v2381_v39 }
 0x533   : > { %v1328_v5 = vpack.c.bf16 %v1319_v4, %v1319_v4  ;;  %v2182_v6 = vpop.f32.mrb[17].mxu0  ;;  %2210 = vmatprep.subr.bf16.mxu1 %v2724_v1 }
 0x534   : > { %v1322_v7 = vpop.f32.mrb[18].mxu0 }
 0x535   : > { %v2183_v8 = vpop.f32.mrb[19].mxu0  ;;  %2205 = vmatmul.mubr.msk.bf16.vlgmr.msra.gmra.mrb[24].mxu0 %vm898_vm3, %v1328_v5 }
 0x536   : > { %2224 = vmatprep.mubr.msk.bf16.mxu0 %vm2725_vm1, %v2724_v1  ;;  %2211 = vmatpush3.bf16.msra.mxu1 %v2382_v40 }
 0x597   : > { %v1375_v9 = vpop.f32.mrb[24].mxu1 }
 0x598   : > { %v2188_v10 = vpop.f32.mrb[25].mxu1  ;;  %v1519_v14 = vsel %vm709_vm2, %v1375_v9, 0.0 }
 0x599   : > { %v1378_v11 = vpop.f32.mrb[26].mxu1 }
 0x59a   : > { %v2189_v12 = vpop.f32.mrb[27].mxu1 }
 0x600   : > { %v1421_v13 = vpop.f32.mrb[20].mxu0 }
 0x601   : > { %v1520_v15 = vsel %vm709_vm2, %v1421_v13, 0.0  ;;  %v2194_v16 = vpop.f32.mrb[21].mxu0 }
 0x602   : > { %v1521_v17 = vadd.f32 %v1520_v15, %v1519_v14  ;;  %v1424_v18 = vpop.f32.mrb[22].mxu0 }
 0x603   : > { %v2195_v19 = vpop.f32.mrb[23].mxu0 }
 0x604   : > { %v1467_v20 = vpop.f32.mrb[28].mxu1 }
 0x605   : > { %v1522_v21 = vsel %vm709_vm2, %v1467_v20, 0.0  ;;  %v2200_v22 = vpop.f32.mrb[29].mxu1 }
 0x606   : > { %v1523_v23 = vadd.f32 %v1522_v21, %v1521_v17  ;;  %v1470_v24 = vpop.f32.mrb[30].mxu1 }
 0x607   : > { %v2201_v25 = vpop.f32.mrb[31].mxu1 }
 0x608   : > { %v1513_v26 = vpop.f32.mrb[24].mxu0 }
 0x609   : > { %v1524_v27 = vsel %vm709_vm2, %v1513_v26, 0.0  ;;  %v2206_v28 = vpop.f32.mrb[25].mxu0 }
 0x60a   : > { %v1525_v29 = vadd.f32 %v1524_v27, %v1523_v23  ;;  %v1516_v30 = vpop.f32.mrb[26].mxu0 }
 0x60b   : > { %v2207_v31 = vpop.f32.mrb[27].mxu0 }
 0x60c   : > { %v1526_v32 = vadd.f32 %v1525_v29, %v3145_v3  ;;  %v2383_v3 = vld [vmem:[%s1633_s7] sm:$0xff]   ;;  %s3537_s7 = sld [smem:[#allocation26_spill]] }
 0x60d   : > { %2217 = vmatpush3.bf16.msra.mxu0 %v2383_v3 }
 0x60e   : > { %v1531_v33 = vsel %vm709_vm2, %v1526_v32, 0.0  ;;  %2218 = vmatprep.subr.bf16.mxu0 %v2724_v1 }
 0x60f   : > { %1532 = vadd.xlane.f32.xlu1 %v1531_v33 }
 0x611   : > { %2219 = vmatpush3.bf16.msra.mxu0 %v2384_v41 }
 0x612   : > { %2220 = vmatprep.subr.bf16.mxu0 %v2724_v1  ;;  %p3540_p0 = scmp.ne.s32.totalorder %s3537_s7, 0 }
 0x614   : > { %p2555_p7 = pnand %p2554_p9, %p3540_p0 }
 0x615   : > { %2221 = vmatpush3.bf16.msra.mxu0 %v2385_v52 }
 0x616   : > { %2222 = vmatprep.subr.bf16.mxu0 %v2724_v1  ;;  %v2049_v1 = vld [vmem:[%s1642_s1] ss:$0 sm:$0xff]  ;;  %p2556_p11 = pneg %p2555_p7 }
 0x618   : > { %p2563_p10 = pnand %p2562_p3, %p2556_p11 }
 0x619   : > { %2223 = vmatpush3.bf16.msra.mxu0 %v2386_v53 }
 0x69c   : > { %v1533_v34 = vpop.xlane.xlu1 %1532 }
 0x69d   : > { %v1535_v35 = vmul.f32 0.03125, %v1533_v34 }
 0x69f   : > { %v1536_v36 = vsub.f32 %v1526_v32, %v1535_v35 }
 0x6a1   : > { %v1537_v37 = vmul.f32 %v1536_v36, %v1536_v36 }
 0x6a3   : > { %v1538_v38 = vsel %vm709_vm2, %v1537_v37, 0.0 }
 0x6a4   : > { %1539 = vadd.xlane.f32.xlu0 %v1538_v38 }
 0x731   : > { %v1540_v42 = vpop.xlane.xlu0 %1539 }
 0x732   : > { %v1541_v43 = vmul.f32 0.03125, %v1540_v42 }
 0x734   : > { %v1542_v44 = vadd.f32 1e-06, %v1541_v43 }
 0x736   : > { %2403 = vrsqrt.f32 %v1542_v44 }
 0x740   : > { %v2404_v45 = vpop.eup %2403 }
 0x741   : > { %v1544_v47 = vmul.f32 %v2404_v45, %v1536_v36 }
 0x743   : > { %v1551_v49 = vmul.f32 %v2040_v46, %v1544_v47 }
 0x745   : > { %v1558_v50 = vadd.f32 %v2041_v48, %v1551_v49 }
 0x747   : > { %v1559_v51 = vpack.c.bf16 %v1558_v50, %v1558_v50 }
 0x749   : > { %2213 = vmatmul.mubr.msk.bf16.vlgmr.msra.gmra.mrb[32].mxu1 %vm709_vm2, %v1559_v51 }
 0x81c   : > { %v1623_v55 = vpop.f32.mrb[32].mxu1 }
 0x81d   : > { %v1624_v56 = vadd.f32 %v2043_v54, %v1623_v55  ;;  %v2214_v57 = vpop.f32.mrb[33].mxu1 }
 0x81e   : > { %v1626_v58 = vpop.f32.mrb[34].mxu1 }
 0x81f   : > { %v1629_v59 = vmax.f32 %v1624_v56, 0.0  ;;  %v2215_v60 = vpop.f32.mrb[35].mxu1 }
 0x821   : > { %v1630_v61 = vpack.c.bf16 %v1629_v59, %v1629_v59 }
 0x823   : > { %2225 = vmatmul.mubr.msk.bf16.vlgmr.msra.gmra.mrb[28].mxu0 %vm1674_vm6, %v1630_v61 }
 0x8f6   : > { %v1712_v62 = vpop.f32.mrb[28].mxu0 }
 0x8f7   : > { %v1713_v63 = vadd.f32 %v2049_v1, %v1712_v62  ;;  %v2226_v0 = vpop.f32.mrb[29].mxu0 }
 0x8f8   : > { %v1715_v2 = vpop.f32.mrb[30].mxu0 }
 0x8f9   : > { %v2227_v4 = vpop.f32.mrb[31].mxu0  ;;  %v1718_v5 = vadd.f32 %v1713_v63, %v1558_v50 }
 0x8fb   : > { %v1723_v6 = vsel %vm709_vm2, %v1718_v5, 0.0 }
 0x8fc   : > { %1724 = vadd.xlane.f32.xlu0 %v1723_v6 }
 0x989   : > { %v1725_v7 = vpop.xlane.xlu0 %1724 }
 0x98a   : > { %v1726_v8 = vmul.f32 0.03125, %v1725_v7 }
 0x98c   : > { %v1727_v9 = vsub.f32 %v1718_v5, %v1726_v8 }
 0x98e   : > { %v1728_v10 = vmul.f32 %v1727_v9, %v1727_v9 }
 0x990   : > { %v1729_v11 = vsel %vm709_vm2, %v1728_v10, 0.0 }
 0x991   : > { %1730 = vadd.xlane.f32.xlu1 %v1729_v11 }
 0x992   : > { %2566 = shalt.err (!%p2563_p10)
}
 0x993   : > { %s2567_s15 = scalar_lea.hbm %s3313_s14, 256  ;;  %s2571_s17 = scalar_lea.hbm %s3539_s16, 1024 }
 0x994   : > { %p2568_p13 = scmp.ne.s32.totalorder %s3313_s14, %s2567_s15  ;;  %p2572_p12 = scmp.lt.u32.totalorder %s3313_s14, %s3539_s16 }
 0x995   : > { %p2573_p2 = scmp.lt.u32.totalorder %s2571_s17, %s2567_s15  ;;  %p2575_p9 = scmp.lt.u32.totalorder %s2567_s15, %s3313_s14 }
 0x996   : > { %p2569_p8 = pnand %p2568_p13, %p3540_p0 }
 0x997   : > { %p2574_p5 = por %p2573_p2, %p2572_p12 }
 0x998   : > { %p2570_p1 = pneg %p2569_p8 }
 0x999   : > { %p2576_p7 = por %p2575_p9, %p2574_p5 }
 0x99b   : > { %p2577_p11 = pnand %p2576_p7, %p2570_p1 }
 0x99d   : > { %2580 = shalt.err (!%p2577_p11)
}
 0x99e   : > { %s2730_s11 = smov 64   ;;  %s2731_s13 = smov 4  }
 0x99f   : > { %2243 = dma.vmem_to_hbm [thread:$0]  (%p3540_p0), %s3315_s21, 256, %s3313_s14, %s3319_s18, %s2730_s11, %s2730_s11, %s2731_s13  }
 0x9a0   : > { %s3541_s24 = sld [smem:[#allocation43_spill]]  ;;  %s3542_s15 = sld [smem:[#allocation44_spill]] }
 0x9a1   : > { %s3543_s19 = sld [smem:[#allocation29_spill]]  ;;  %s2059_s7 = sshll.u32 %s3536_s26, 7 }
 0x9a2   : > { %s1771_s21 = sshll.u32 %s3125_s10, 4  ;;  %s3544_s17 = sld [smem:[#allocation45_spill]]  ;;  %s3358_s21 = int_to_ptr.vmem [resolvable:$true] %s1771_s21 }
 0x9a3   : > { %s2581_s28 = scalar_lea.vmem %s3358_s21, 128  ;;  %s2732_s26 = smov [#allocation11]  }
 0x9a4   : > { %p2582_p0 = scmp.ne.s32.totalorder %s3358_s21, %s2581_s28  ;;  %s2585_s11 = sshll.u32 %s2732_s26, 4  ;;  %s2586_s11 = int_to_ptr.vmem [resolvable:$false] %s2585_s11 }
 0x9a5   : > { %s2587_s13 = scalar_lea.vmem %s2586_s11, 256  ;;  %p2588_p10 = scmp.lt.s32.totalorder %s3358_s21, %s2586_s11 }
 0x9a6   : > { %s1719_s20 = scalar_lea.vmem %s3541_s24, %s2699_s27  ;;  %s1721_s1 = scalar_lea.vmem %s3542_s15, %s2699_s27 }
 0x9a7   : > { %v2055_v16 = vld [vmem:[%s1719_s20] ss:$0 sm:$0xff]  ;;  %s1752_s27 = scalar_lea.sflag [#allocation4], %s3100_s5  ;;  %p3545_p6 = scmp.ne.s32.totalorder %s3543_s19, 0 }
 0x9a8   : > { %v2056_v18 = vld [vmem:[%s1721_s1] ss:$0 sm:$0xff]  ;;  %s3356_s29 = scalar_lea.hbm %s3544_s17, %s2059_s7  ;;  %p2589_p13 = scmp.lt.s32.totalorder %s2587_s13, %s2581_s28 }
 0x9a9   : > { %p2583_p4 = pnand %p2582_p0, %p3545_p6 }
 0x9aa   : > { %p2590_p8 = por %p2589_p13, %p2588_p10 }
 0x9ab   : > { %p2584_p3 = pneg %p2583_p4 }
 0x9ad   : > { %p2591_p1 = pnand %p2590_p8, %p2584_p3 }
 0xa1e   : > { %v1731_v12 = vpop.xlane.xlu1 %1730 }
 0xa1f   : > { %v1732_v13 = vmul.f32 0.03125, %v1731_v12 }
 0xa21   : > { %v1733_v14 = vadd.f32 1e-06, %v1732_v13 }
 0xa23   : > { %2405 = vrsqrt.f32 %v1733_v14 }
 0xa2d   : > { %v2406_v15 = vpop.eup %2405 }
 0xa2e   : > { %v1735_v17 = vmul.f32 %v2406_v15, %v1727_v9 }
 0xa30   : > { %v1742_v19 = vmul.f32 %v2055_v16, %v1735_v17 }
 0xa32   : > { %v1749_v20 = vadd.f32 %v2056_v18, %v1742_v19 }
 0xa34   : > { %1750 = vst.msk [vmem:[%s3125_s10] sm:$0xff] %vm709_vm2, %v1749_v20 }
 0xa35   : > { %2594 = shalt.err (!%p2591_p1)
}
 0xa36   : > { %s2595_s5 = scalar_lea.hbm %s3356_s29, 128  ;;  %s2599_s23 = scalar_lea.hbm %s3544_s17, 256 }
 0xa37   : > { %p2596_p12 = scmp.ne.s32.totalorder %s3356_s29, %s2595_s5  ;;  %p2600_p9 = scmp.lt.u32.totalorder %s3356_s29, %s3544_s17 }
 0xa38   : > { %p2601_p7 = scmp.lt.u32.totalorder %s2599_s23, %s2595_s5  ;;  %p2603_p0 = scmp.lt.u32.totalorder %s2595_s5, %s3356_s29 }
 0xa39   : > { %p2597_p2 = pnand %p2596_p12, %p3545_p6 }
 0xa3a   : > { %p2602_p11 = por %p2601_p7, %p2600_p9 }
 0xa3b   : > { %p2598_p5 = pneg %p2597_p2 }
 0xa3c   : > { %p2604_p4 = por %p2603_p0, %p2602_p11 }
 0xa3e   : > { %p2605_p3 = pnand %p2604_p4, %p2598_p5 }
 0xa40   : > { %2608 = shalt.err (!%p2605_p3)
}
 0xa41   : > { %2242 = dma.vmem_to_hbm [thread:$0]  (%p3545_p6), %s3358_s21, 128, %s3356_s29, %s1752_s27  }
 0xa42 PF: > { %s3546_s8 = sld [smem:[#allocation21_spill]]  ;;  %s3547_s6 = sld [smem:[#allocation25_spill]] }
 0xa43   : > { %p2275_p10 = scmp.ge.s32.totalorder %s2715_s0, 2 }
 0xa48   : > { %s1802_s15 = sand.u32 1, %s3546_s8   ;;  %p3548_p13 = scmp.ne.s32.totalorder %s3547_s6, 0 }
 0xa49   : > { %s1803_s1 = scalar_lea.sflag [#allocation4], %s1802_s15 }
 0xa4a   : > { %p2264_p8 = pnand %p2275_p10, %p3548_p13 }
 0xa4c   : > { %2666 = dma.done.wait (!%p2264_p8), %s1803_s1, 128  }
 0xa4d   : > { %2668 = vsyncadd (!%p2264_p8), %s1803_s1, 4294967168  ;;  %s3549_s7 = sld [smem:[#allocation19_spill]]  ;;  %s3550_s14 = sld [smem:[#allocation27_spill]] }
 0xa53   : > { %s1811_s18 = sand.u32 1, %s3549_s7   ;;  %p3551_p1 = scmp.ne.s32.totalorder %s3550_s14, 0 }
 0xa54   : > { %s1812_s19 = scalar_lea.sflag [#allocation13], %s1811_s18 }
 0xa55   : > { %p2267_p12 = pnand %p2275_p10, %p3551_p1 }
 0xa57   : > { %2670 = dma.done.wait (!%p2267_p12), %s1812_s19, 256  }
 0xa58   : > { %2672 = vsyncadd (!%p2267_p12), %s1812_s19, 4294967040  ;;  %s40_s0 = sadd.s32 1, %s2715_s0   ;;  %s3552_s29 = sld [smem:[#allocation20_spill]] }
 0xa59   : > { %p37_p6 = scmp.ge.s32.totalorder %s40_s0, 6   ;;  %s3553_s23 = sld [smem:[#allocation32_spill]] }
 0xa5a   : > { %s3554_s27 = sld [smem:[#allocation22_spill]]  ;;  %s3555_s26 = sld [smem:[#allocation31_spill]] }
 0xa5b   : > { %s3556_s28 = sld [smem:[#allocation24_spill]]  ;;  %s3557_s11 = sld [smem:[#allocation28_spill]] }
 0xa5c   : > { %s3558_s13 = sld [smem:[#allocation30_spill]]  ;;  %s3559_s21 = smov %s2679_s22 }
 0xa5d   : > { %s3561_s24 = smov %s2691_s25  ;;  %39 = sbr.rel (!%p37_p6) target bundleno = 29 (0x1d), region = 190 }
 0xa5e   : > { %s3560_s22 = smov %s3552_s29 }
 0xa60   : > { %s3562_s25 = smov %s3554_s27 }
 0xa61   : > { %s3563_s27 = smov %s3556_s28  ;;  %s3564_s28 = smov %s2711_s30 }
 0xa62   : > { %s3565_s29 = smov %s3557_s11  ;;  %s3566_s30 = smov %s3558_s13 }
 0xa64   :  { %1817 = vsyncpa [#allocation3], 1 }
 0xa65   :  { %1819 = vsyncpa [#allocation3 + $0x1], 1 }
 0xa66   :  { %1820 = vsyncpa [#allocation6], 1 }
 0xa67   :  { %1822 = vsyncpa [#allocation6 + $0x1], 1 }
 0xa68   :  { %1823 = vsyncpa [#allocation9], 1 }
 0xa69   :  { %1824 = vsyncpa [#allocation4], 1 }
 0xa6a   :  { %1826 = vsyncpa [#allocation4 + $0x1], 1 }
 0xa6b   :  { %1827 = vsyncpa [#allocation13], 1 }
 0xa6c   :  { %1829 = vsyncpa [#allocation13 + $0x1], 1 }

</bundles_post_ra>
